<compile_context>
chip_gen: v6e
topology: v6e:2x2x1
jax: 0.10.0
libtpu: 0.0.40
codegen_flags: <defaults>
</compile_context>

<pallas_src>
import jax
import jax.numpy as jnp
from jax.experimental import pallas as pl
from jax.experimental.pallas import tpu as pltpu

D_IN, D_H1, D_H2, D_OUT = 1280, 128, 32, 1


def mlp_kernel(x_ref, w1_ref, b1_ref, w2_ref, b2_ref, w3_ref, b3_ref, o_ref):
    # x arrives as f32 straight from HBM; cast to bf16 here (VPU pass, fully hidden
    # under the x-tile DMA) so the big GEMM runs on the native bf16 MXU path.
    x = x_ref[...].astype(jnp.bfloat16)

    # ---- linear1 + ReLU (bf16 MXU, f32 accumulation) -> (tile_b, 128)
    h1 = jnp.dot(x, w1_ref[...], preferred_element_type=jnp.float32)
    h1 = jnp.maximum(h1 + b1_ref[...], 0.0)

    # ---- linear2 + ReLU, computed transposed so batch lands on lanes:
    #      W2[32,128] @ H1^T[128,tile_b] -> (32, tile_b).  bf16 operands, f32 acc.
    h2t = jax.lax.dot_general(
        w2_ref[...], h1.astype(jnp.bfloat16),
        dimension_numbers=(((1,), (1,)), ((), ())),
        preferred_element_type=jnp.float32,
    )
    h2t = jnp.maximum(h2t + b2_ref[...], 0.0)

    # ---- linear3 (32 -> 1) on the VPU/XLU: broadcast-multiply + sublane reduction.
    #      Keeps the output lane-dense and avoids an N=1 MXU pass.  -> (1, tile_b)
    h3t = jnp.sum(h2t * w3_ref[...], axis=0, keepdims=True) + b3_ref[...]

    # Sigmoid lives on the EUP slot.
    o_ref[...] = jax.nn.sigmoid(h3t).astype(o_ref.dtype)
    # TODO(synk): torch Dropout(0.3) in training mode would need pltpu.prng_seed /
    #             pltpu.prng_random_bits masking; eval-mode dropout is the identity.


def mlp_forward(x, w1, b1, w2, b2, w3, b3, *, tile_b=None):
    """x: (B, 1280) f32.  Params in math layout:
       w1 (1280,128), b1 (1,128), w2 (128,32), b2 (1,32), w3 (32,1), b3 (1,1)."""
    B = x.shape[0]
    assert x.shape[1] == D_IN

    if tile_b is None:
        # 128-aligned tiles.  Aim for a grid of length >= 2 (so both v7x TensorCores get
        # work), cap at 1024 rows (f32 x tile 5.25 MiB; a few buffers stay comfortably
        # inside v7x's 64 MiB VMEM while amortizing per-grid-step overhead), and never
        # exceed the 128-rounded batch.
        per_core = 128 * pl.cdiv(pl.cdiv(B, 2), 128)
        tile_b = min(1024, max(128, per_core), 128 * pl.cdiv(B, 128))
    assert tile_b % 8 == 0

    num_tiles = pl.cdiv(B, tile_b)

    # Weights are tiny and grid-resident (constant index_maps): pre-cast the GEMM
    # operands to bf16 once; biases stay f32.
    w1q = w1.astype(jnp.bfloat16)                     # (1280, 128)
    w2t = jnp.transpose(w2).astype(jnp.bfloat16)      # (32, 128)
    b2c = jnp.reshape(b2, (D_H2, 1))                  # (32, 1)
    w3c = jnp.reshape(w3, (D_H2, 1))                  # (32, 1)
    b3c = jnp.reshape(b3, (1, 1))                     # (1, 1)

    def full(shape):
        return pl.BlockSpec(shape, lambda i: (0,) * len(shape))

    weight_bytes = (w1q.size * 2 + b1.size * 4 + w2t.size * 2
                    + b2c.size * 4 + w3c.size * 4 + b3c.size * 4)
    cost = pl.CostEstimate(
        flops=2 * B * (D_IN * D_H1 + D_H1 * D_H2 + D_H2 * D_OUT),
        transcendentals=B,                                   # one sigmoid per row
        bytes_accessed=B * D_IN * 4 + weight_bytes + num_tiles * tile_b * 4,
    )

    args = (x, w1q, b1, w2t, b2c, w3c, b3c)

    def run(x_spec):
        return pl.pallas_call(
            mlp_kernel,
            out_shape=jax.ShapeDtypeStruct((num_tiles, 1, tile_b), jnp.float32),
            grid_spec=pltpu.PrefetchScalarGridSpec(
                num_scalar_prefetch=0,
                grid=(num_tiles,),
                in_specs=[
                    x_spec,                                           # x tile (f32, streamed)
                    full((D_IN, D_H1)), full((1, D_H1)),              # linear1
                    full((D_H2, D_H1)), full((D_H2, 1)),              # linear2 (transposed)
                    full((D_H2, 1)), full((1, 1)),                    # linear3
                ],
                # Lane-dense output slab: batch on lanes, one (1, tile_b) row per step.
                out_specs=pl.BlockSpec((None, 1, tile_b), lambda i: (i, 0, 0)),
            ),
            compiler_params=pltpu.CompilerParams(
                dimension_semantics=("parallel",),
                vmem_limit_bytes=48 * 1024 * 1024,
            ),
            cost_estimate=cost,
        )(*args)

    out = None
    if hasattr(pl, "Buffered"):
        try:
            # Triple-buffer the only streamed operand (DMA-limited pipeline).
            out = run(pl.BlockSpec((tile_b, D_IN), lambda i: (i, 0),
                                   pipeline_mode=pl.Buffered(3)))
        except Exception:
            out = None  # pipeline_mode not supported on this JAX build; fall back.
    if out is None:
        out = run(pl.BlockSpec((tile_b, D_IN), lambda i: (i, 0)))

    # No input padding: rows past B in the last (ragged) tile are undefined, but every
    # op is row-independent, so they are simply sliced off here.
    # torch's x.squeeze() removes the trailing size-1 dim -> (B,).
    return out.reshape(-1)[:B]


def init_params(key):
    # Deterministic PyTorch-style uniform(-1/sqrt(fan_in), 1/sqrt(fan_in)) init.
    ks = jax.random.split(key, 6)

    def lin(kw, kb, fan_in, fan_out):
        bound = 1.0 / jnp.sqrt(jnp.float32(fan_in))
        w = jax.random.uniform(kw, (fan_in, fan_out), jnp.float32, -bound, bound)
        b = jax.random.uniform(kb, (1, fan_out), jnp.float32, -bound, bound)
        return w, b

    w1, b1 = lin(ks[0], ks[1], D_IN, D_H1)
    w2, b2 = lin(ks[2], ks[3], D_H1, D_H2)
    w3, b3 = lin(ks[4], ks[5], D_H2, D_OUT)
    return w1, b1, w2, b2, w3, b3


if __name__ == "__main__":
    key = jax.random.PRNGKey(0)
    kx, kp = jax.random.split(key)

    # Small, non-tile-aligned batch: exercises the multi-tile grid + ragged tail path.
    B = 200
    x = jax.random.normal(kx, (B, D_IN), dtype=jnp.float32)
    params = init_params(kp)

    y = mlp_forward(x, *params)
    jax.block_until_ready(y)

    # Pure-JAX reference with the same bf16 rounding the kernel applies
    # (x/w1 for layer 1, h1/w2 for layer 2), f32 math elsewhere.
    w1, b1, w2, b2, w3, b3 = params
    hp = jax.lax.Precision.HIGHEST
    rt = lambda a: a.astype(jnp.bfloat16).astype(jnp.float32)
    h = jnp.maximum(jnp.dot(rt(x), rt(w1), precision=hp) + b1, 0.0)
    h = jnp.maximum(jnp.dot(rt(h), rt(w2), precision=hp) + b2, 0.0)
    ref = jax.nn.sigmoid(jnp.dot(h, w3, precision=hp) + b3).squeeze(-1)

    assert y.shape == (B,)
    err = float(jnp.max(jnp.abs(y - ref)))
    assert jnp.allclose(y, ref, atol=2e-3, rtol=0.0), err

    print("KERNEL_OK")
</pallas_src>

<mosaic_0001>
module attributes {stable_mosaic.version = 11 : i64} {
  func.func @mlp_kernel(%arg0: i32, %arg1: memref<128x1280xf32, #tpu.memory_space<vmem>>, %arg2: memref<1280x128xbf16, #tpu.memory_space<vmem>>, %arg3: memref<1x128xf32, #tpu.memory_space<vmem>>, %arg4: memref<32x128xbf16, #tpu.memory_space<vmem>>, %arg5: memref<32x1xf32, #tpu.memory_space<vmem>>, %arg6: memref<32x1xf32, #tpu.memory_space<vmem>>, %arg7: memref<1x1xf32, #tpu.memory_space<vmem>>, %arg8: memref<1x1x128xf32, #tpu.memory_space<vmem>>) attributes {dimension_semantics = [#tpu.dimension_semantics<parallel>], iteration_bounds = array<i64: 2>, scalar_prefetch = 0 : i64, scratch_operands = 0 : i64, tpu.core_type = #tpu.core_type<tc>, window_params = [{transform_indices = @transform_0, window_bounds = array<i64: 128, 1280>}, {pipeline_mode = #tpu.pipeline_mode<synchronous>, transform_indices = @transform_1, window_bounds = array<i64: 1280, 128>}, {pipeline_mode = #tpu.pipeline_mode<synchronous>, transform_indices = @transform_2, window_bounds = array<i64: 1, 128>}, {pipeline_mode = #tpu.pipeline_mode<synchronous>, transform_indices = @transform_3, window_bounds = array<i64: 32, 128>}, {pipeline_mode = #tpu.pipeline_mode<synchronous>, transform_indices = @transform_4, window_bounds = array<i64: 32, 1>}, {pipeline_mode = #tpu.pipeline_mode<synchronous>, transform_indices = @transform_5, window_bounds = array<i64: 32, 1>}, {pipeline_mode = #tpu.pipeline_mode<synchronous>, transform_indices = @transform_6, window_bounds = array<i64: 1, 1>}, {transform_indices = @transform_7, window_bounds = array<i64: 1, 1, 128>}]} {
    %c0 = arith.constant 0 : index
    %c0_0 = arith.constant 0 : index
    %0 = vector.load %arg1[%c0, %c0_0] : memref<128x1280xf32, #tpu.memory_space<vmem>>, vector<128x1280xf32>
    %1 = arith.truncf %0 : vector<128x1280xf32> to vector<128x1280xbf16>
    %c0_1 = arith.constant 0 : index
    %c0_2 = arith.constant 0 : index
    %2 = vector.load %arg2[%c0_1, %c0_2] : memref<1280x128xbf16, #tpu.memory_space<vmem>>, vector<1280x128xbf16>
    %cst = arith.constant dense<0.000000e+00> : vector<128x128xf32>
    %3 = tpu.matmul %1, %2, %cst {dimension_numbers = #tpu.dot_dimension_numbers<[1], [0], [0], [1], [0, 0, 1, 1], [], []>} : vector<128x1280xbf16>, vector<1280x128xbf16>, vector<128x128xf32> -> vector<128x128xf32>
    %c0_3 = arith.constant 0 : index
    %c0_4 = arith.constant 0 : index
    %4 = vector.load %arg3[%c0_3, %c0_4] : memref<1x128xf32, #tpu.memory_space<vmem>>, vector<1x128xf32>
    %5 = vector.broadcast %4 : vector<1x128xf32> to vector<128x128xf32>
    %6 = arith.addf %3, %5 : vector<128x128xf32>
    %cst_5 = arith.constant 0.000000e+00 : f32
    %7 = vector.broadcast %cst_5 : f32 to vector<128x128xf32>
    %8 = arith.maximumf %6, %7 : vector<128x128xf32>
    %c0_6 = arith.constant 0 : index
    %c0_7 = arith.constant 0 : index
    %9 = vector.load %arg4[%c0_6, %c0_7] : memref<32x128xbf16, #tpu.memory_space<vmem>>, vector<32x128xbf16>
    %10 = arith.truncf %8 : vector<128x128xf32> to vector<128x128xbf16>
    %cst_8 = arith.constant dense<0.000000e+00> : vector<32x128xf32>
    %11 = tpu.matmul %9, %10, %cst_8 {dimension_numbers = #tpu.dot_dimension_numbers<[1], [1], [0], [0], [0, 0, 1, 0], [], []>} : vector<32x128xbf16>, vector<128x128xbf16>, vector<32x128xf32> -> vector<32x128xf32>
    %c0_9 = arith.constant 0 : index
    %c0_10 = arith.constant 0 : index
    %12 = vector.load %arg5[%c0_9, %c0_10] : memref<32x1xf32, #tpu.memory_space<vmem>>, vector<32x1xf32>
    %13 = vector.broadcast %12 : vector<32x1xf32> to vector<32x128xf32>
    %14 = arith.addf %11, %13 : vector<32x128xf32>
    %cst_11 = arith.constant 0.000000e+00 : f32
    %15 = vector.broadcast %cst_11 : f32 to vector<32x128xf32>
    %16 = arith.maximumf %14, %15 : vector<32x128xf32>
    %c0_12 = arith.constant 0 : index
    %c0_13 = arith.constant 0 : index
    %17 = vector.load %arg6[%c0_12, %c0_13] : memref<32x1xf32, #tpu.memory_space<vmem>>, vector<32x1xf32>
    %18 = vector.broadcast %17 : vector<32x1xf32> to vector<32x128xf32>
    %19 = arith.mulf %16, %18 : vector<32x128xf32>
    %cst_14 = arith.constant dense<0.000000e+00> : vector<128xf32>
    %20 = vector.multi_reduction <add>, %19, %cst_14 [0] : vector<32x128xf32> to vector<128xf32>
    %21 = vector.shape_cast %20 : vector<128xf32> to vector<1x128xf32>
    %c0_15 = arith.constant 0 : index
    %c0_16 = arith.constant 0 : index
    %22 = vector.load %arg7[%c0_15, %c0_16] : memref<1x1xf32, #tpu.memory_space<vmem>>, vector<1x1xf32>
    %23 = vector.broadcast %22 : vector<1x1xf32> to vector<1x128xf32>
    %24 = arith.addf %21, %23 : vector<1x128xf32>
    %25 = arith.negf %24 : vector<1x128xf32>
    %26 = math.exp %25 : vector<1x128xf32>
    %cst_17 = arith.constant 1.000000e+00 : f32
    %27 = vector.broadcast %cst_17 : f32 to vector<1x128xf32>
    %28 = arith.addf %27, %26 : vector<1x128xf32>
    %29 = arith.divf %27, %28 : vector<1x128xf32>
    %c0_18 = arith.constant 0 : index
    %c0_19 = arith.constant 0 : index
    %c0_20 = arith.constant 0 : index
    %30 = vector.load %arg8[%c0_18, %c0_19, %c0_20] : memref<1x1x128xf32, #tpu.memory_space<vmem>>, vector<1x1x128xf32>
    %31 = vector.shape_cast %30 : vector<1x1x128xf32> to vector<1x128xf32>
    %32 = vector.shape_cast %29 : vector<1x128xf32> to vector<1x1x128xf32>
    tpu.vector_store %arg8[%c0_18, %c0_19, %c0_20], %32 {strides = array<i32>} : memref<1x1x128xf32, #tpu.memory_space<vmem>>, vector<1x1x128xf32>,
    return
  }
  func.func @transform_0(%arg0: i32) -> (i32, i32) {
    %c0_i32 = arith.constant 0 : i32
    %c0_i32_0 = arith.constant 0 : i32
    return %arg0, %c0_i32 : i32, i32
  }
  func.func @transform_1(%arg0: i32) -> (i32, i32) {
    %c0_i32 = arith.constant 0 : i32
    %c0_i32_0 = arith.constant 0 : i32
    %c0_i32_1 = arith.constant 0 : i32
    return %c0_i32, %c0_i32_0 : i32, i32
  }
  func.func @transform_2(%arg0: i32) -> (i32, i32) {
    %c0_i32 = arith.constant 0 : i32
    %c0_i32_0 = arith.constant 0 : i32
    %c0_i32_1 = arith.constant 0 : i32
    return %c0_i32, %c0_i32_0 : i32, i32
  }
  func.func @transform_3(%arg0: i32) -> (i32, i32) {
    %c0_i32 = arith.constant 0 : i32
    %c0_i32_0 = arith.constant 0 : i32
    %c0_i32_1 = arith.constant 0 : i32
    return %c0_i32, %c0_i32_0 : i32, i32
  }
  func.func @transform_4(%arg0: i32) -> (i32, i32) {
    %c0_i32 = arith.constant 0 : i32
    %c0_i32_0 = arith.constant 0 : i32
    %c0_i32_1 = arith.constant 0 : i32
    return %c0_i32, %c0_i32_0 : i32, i32
  }
  func.func @transform_5(%arg0: i32) -> (i32, i32) {
    %c0_i32 = arith.constant 0 : i32
    %c0_i32_0 = arith.constant 0 : i32
    %c0_i32_1 = arith.constant 0 : i32
    return %c0_i32, %c0_i32_0 : i32, i32
  }
  func.func @transform_6(%arg0: i32) -> (i32, i32) {
    %c0_i32 = arith.constant 0 : i32
    %c0_i32_0 = arith.constant 0 : i32
    %c0_i32_1 = arith.constant 0 : i32
    return %c0_i32, %c0_i32_0 : i32, i32
  }
  func.func @transform_7(%arg0: i32) -> (i32, i32, i32) {
    %c0_i32 = arith.constant 0 : i32
    %c0_i32_0 = arith.constant 0 : i32
    %c0_i32_1 = arith.constant 0 : i32
    return %arg0, %c0_i32, %c0_i32_0 : i32, i32, i32
  }
}

</mosaic_0001>

<bundles_post_ra>
// kernel: tpu_custom_call.1
= control target key start
LH: loop header
LB: loop body
LE: loop exit
PB: predicated region body
PF: predicated region fallthrough
CT: control target
= control target key end

     0   :  { %s3240_s0 = inlined_call_operand.hbm [shape: f32[200,1280], index: 0, kind: input, shape index: {}]   ;;  %s3241_s1 = inlined_call_operand.hbm [shape: bf16[1280,128], index: 1, kind: input, shape index: {}]   ;;  %s3242_s2 = inlined_call_operand.vmem [shape: f32[1,128], index: 2, kind: input, shape index: {}]   ;;  %s3243_s3 = inlined_call_operand.vmem [shape: bf16[32,128], index: 3, kind: input, shape index: {}]   ;;  %s3244_s4 = inlined_call_operand.vmem [shape: f32[32,1], index: 4, kind: input, shape index: {}]   ;;  %s3245_s5 = inlined_call_operand.vmem [shape: f32[32,1], index: 5, kind: input, shape index: {}]   ;;  %s3246_s6 = inlined_call_operand.<no memory space> [shape: f32[1,1], index: 6, kind: input, shape index: {}]   ;;  %s3247_s7 = inlined_call_operand.hbm [shape: f32[2,1,128], index: 7, kind: output, shape index: {}]  }
   0x1   :  { %v12_v0 = vstv %s3246_s6 }
   0x2   :  { %13 = vst [vmem:[#allocation2] sm:$0x1] %v12_v0 }
   0x3   :  { %14 = vsyncpa [#allocation4], 0 }
   0x4   :  { %16 = vsyncpa [#allocation4 + $0x1], 0 }
   0x5   :  { %17 = vsyncpa [#allocation7], 0 }
   0x6   :  { %18 = vsyncpa [#allocation5], 0 }
   0x7   :  { %20 = vsyncpa [#allocation5 + $0x1], 0  ;;  %s2747_s26 = smov 0   ;;  %s2749_s27 = smov 0  }
   0x8   :  { %s2751_s28 = smov 0   ;;  %s2753_s29 = smov 0  }
   0x9 LB: > { %s2768_s6 = sadd.s32 4294967295, %s2694_s29   ;;  %s1961_s30 = sadd.s32 4294967294, %s2694_s29   ;;  %s2694_s29 = sphi %s2753_s29, %s3263_s29   ;;  %s2690_s28 = sphi %s2751_s28, %s3262_s28   ;;  %s2686_s27 = sphi %s2749_s27, %s3261_s27   ;;  %s2682_s26 = sphi %s2747_s26, %s3260_s26  }
   0xa   : > { %s2772_s8 = sadd.s32 1, %s2694_s29   ;;  %s33_s9 = sadd.s32 1, %s2690_s28 }
   0xb   : > { %s30_s10 = ssub.s32 %s2694_s29, %s2772_s8  ;;  %p40_p0 = scmp.ne.s32.totalorder %s2690_s28, %s2686_s27 }
   0xc   : > { %p31_p1 = scmp.eq.s32.totalorder %s30_s10, 0  ;;  %p41_p2 = scmp.eq.s32.totalorder %s2694_s29, 0 }
   0xd   : > { %p46_p3 = scmp.ne.s32.totalorder %s2686_s27, %s2682_s26  ;;  %p47_p4 = scmp.eq.s32.totalorder %s2768_s6, 0 }
   0xe   : > { %s2784_s11 = scalar_select %p31_p1, %s2690_s28, %s33_s9  }
   0xf   : > { %p2786_p5 = por %p41_p2, %p40_p0  ;;  %p2792_p6 = por %p47_p4, %p46_p3 }
  0x10   : > { %p196_p7 = scmp.eq.s32.totalorder %s2768_s6, 1  ;;  %p202_p8 = scmp.eq.s32.totalorder %s1961_s30, 1 }
  0x11   : > { %s3252_s13 = scalar_select %p2792_p6, 1, 0 }
  0x12   : > { %p1962_p9 = scmp.ge.s32.totalorder %s2694_s29, 1  ;;  %p209_p10 = scmp.lt.s32.totalorder %s2694_s29, 3 }
  0x13   : > { %p2799_p11 = por %p196_p7, %p40_p0  ;;  %p2803_p12 = por %p202_p8, %p46_p3 }
  0x14   : > { %p2807_p13 = pnand %p1962_p9, %p209_p10  ;;  %s2696_s17 = smov [#allocation6]  }
  0x15   : > { %s3253_s14 = scalar_select %p2799_p11, 1, 0 }
  0x16   : > { %s3254_s15 = scalar_select %p2803_p12, 1, 0 }
  0x17   : > { %p2437_p1 = pneg %p2807_p13  ;;  %s221_s18 = sshll.u32 %s2696_s17, 4  ;;  %s222_s18 = int_to_ptr.vmem [resolvable:$true] %s221_s18 }
  0x18   : > { %s2585_s19 = scalar_lea.vmem %s222_s18, 10240  ;;  %p2593_p8 = scmp.lt.s32.totalorder %s222_s18, %s222_s18 }
  0x19   : > { %p2438_p2 = pnand %p2437_p1, %p47_p4  ;;  %p2586_p7 = scmp.ne.s32.totalorder %s222_s18, %s2585_s19 }
  0x1a   : > { %p2594_p6 = scmp.lt.s32.totalorder %s2585_s19, %s2585_s19 }
  0x1b   : > { %p2576_p0 = pneg %p2438_p2 }
  0x1c   : > { %p2595_p12 = por %p2594_p6, %p2593_p8 }
  0x1d   : > { %p2588_p11 = pnand %p2586_p7, %p2576_p0 }
  0x1f   : > { %p2589_p3 = pneg %p2588_p11 }
  0x21   : > { %p2596_p9 = pnand %p2595_p12, %p2589_p3 }
  0x23   : > { %2599 = shalt.err (!%p2596_p9)
}
  0x24   : > { %s2697_s20 = smov 64   ;;  %s2698_s21 = smov 4  }
  0x25   : > { %2440 = dma.hbm_to_vmem [thread:$0]  (!%p2438_p2), %s3241_s1, 10240, %s222_s18, [#allocation7], %s2697_s20, %s2697_s20, %s2698_s21  }
  0x26   : > { %p3250_p10 = scmp.ge.s32.totalorder %s2694_s29, 2 }
  0x28   : > { %246 = sbr.rel (%p3250_p10) target bundleno = 79 (0x4f), region = 40 }
  0x2d   : > { %249 = sbr.rel (!%p2786_p5) target bundleno = 79 (0x4f), region = 44  ;;  %s250_s24 = sand.u32 (%p2786_p5), 1, %s2690_s28  }
  0x2e   : > { %s1965_s25 = sshll.u32 (%p2786_p5), %s2694_s29, 4  ;;  %s2427_s30 = smul.u32 (%p2786_p5), 1280, %s250_s24 }
  0x2f   : > { %s256_s9 = ssub.s32 (%p2786_p5), 25, %s1965_s25  ;;  %s2828_s18 = scalar_lea.sflag (%p2786_p5), [#allocation4], %s250_s24 }
  0x30   : > { %p257_p6 = scmp.lt.s32.totalorder (%p2786_p5), %s256_s9, 16  ;;  %s254_s19 = scalar_lea.vmem (%p2786_p5), [#allocation3], %s2427_s30 }
  0x32   : > { %s3265_s9 = smov (!%p257_p6, %s256_s9), 16 }
  0x33   : > { %s2825_s10 = smul.u32 1280, %s3265_s9 }
  0x35   : > { %s262_s17 = ssub.s32 20480, %s2825_s10 }
  0x36   : > { %263 = vsyncadd %s2828_s18, %s262_s17  ;;  %p1968_p5 = scmp.ne.s32.totalorder %s2825_s10, 0  ;;  %s2428_s12 = smul.u32 20480, %s2694_s29 }
  0x37   : > { %s269_s20 = sshll.u32 %s254_s19, 4  ;;  %s2604_s9 = scalar_lea.hbm %s3240_s0, 32000  ;;  %s2838_s20 = int_to_ptr.vmem [resolvable:$true] %s269_s20 }
  0x38   : > { %s2836_s23 = scalar_lea.hbm %s3240_s0, %s2428_s12 }
  0x39   : > { %s2600_s24 = scalar_lea.hbm %s2836_s23, %s2825_s10  ;;  %p2605_p2 = scmp.lt.s32.totalorder %s2836_s23, %s3240_s0 }
  0x3a   : > { %p2601_p11 = scmp.ne.s32.totalorder %s2836_s23, %s2600_s24  ;;  %p2606_p0 = scmp.lt.s32.totalorder %s2604_s9, %s2600_s24 }
  0x3c   : > { %p2602_p12 = pnand %p2601_p11, %p1968_p5  ;;  %p2607_p7 = por %p2606_p0, %p2605_p2 }
  0x3e   : > { %p2603_p1 = pneg %p2602_p12 }
  0x40   : > { %p2608_p3 = pnand %p2607_p7, %p2603_p1 }
  0x42   : > { %2611 = shalt.err (!%p2608_p3)
}
  0x43   : > { %s2612_s12 = scalar_lea.vmem %s2838_s20, %s2825_s10  ;;  %s2699_s21 = smov [#allocation3]  }
  0x44   : > { %p2613_p8 = scmp.ne.s32.totalorder %s2838_s20, %s2612_s12  ;;  %s2616_s22 = sshll.u32 %s2699_s21, 4  ;;  %s2617_s22 = int_to_ptr.vmem [resolvable:$false] %s2616_s22 }
  0x45   : > { %s2618_s25 = scalar_lea.vmem %s2617_s22, 40960  ;;  %p2619_p11 = scmp.lt.s32.totalorder %s2838_s20, %s2617_s22 }
  0x46   : > { %p2614_p9 = pnand %p2613_p8, %p1968_p5  ;;  %p2620_p12 = scmp.lt.s32.totalorder %s2618_s25, %s2612_s12 }
  0x48   : > { %p2615_p6 = pneg %p2614_p9  ;;  %p2621_p10 = por %p2620_p12, %p2619_p11 }
  0x4a   : > { %p2622_p2 = pnand %p2621_p10, %p2615_p6 }
  0x4c   : > { %2625 = shalt.err (!%p2622_p2)
}
  0x4d   : > { %s2700_s24 = smov 1280   ;;  %s2701_s30 = smov 80  }
  0x4e   : > { %275 = dma.hbm_to_vmem [thread:$0]  (%p1968_p5), %s2836_s23, %s2825_s10, %s2838_s20, %s2828_s18, %s2700_s24, %s2700_s24, %s2701_s30  }
  0x4f PF: > { %281 = sbr.rel (%p2807_p13) target bundleno = 815 (0x32f), region = 48  ;;  %s2867_s9 = sand.u32 (!%p2807_p13), 1, %s2686_s27  }
  0x50   : > { %s2429_s17 = smul.u32 (!%p2807_p13), 1280, %s2867_s9  ;;  %s284_s19 = scalar_lea.sflag (!%p2807_p13), [#allocation4], %s2867_s9 }
  0x51   : > { %p3256_p10 = scmp.ne.s32.totalorder (!%p2807_p13), %s3252_s13, 0 }
  0x52   : > { %s2871_s12 = scalar_lea.vmem (!%p2807_p13), [#allocation3], %s2429_s17 }
  0x54   : > { %2669 = dma.done.wait (%p3256_p10), %s284_s19, 20480  }
  0x55   : > { %2671 = vsyncadd (%p3256_p10), %s284_s19, 4294946816 }
  0x56   : > { %2673 = dma.done.wait (%p47_p4), [#allocation7], 10240  }
  0x57   : > { %2675 = vsyncadd (%p47_p4), [#allocation7], 4294957056  ;;  %v2488_v1 = vld [vmem:[#allocation6 + $0x78] sm:$0xff]   ;;  %v2490_v3 = vld [vmem:[#allocation6 + $0x70] sm:$0xff]   ;;  %s2058_s25 = sshll.u32 %s2768_s6, 4  ;;  %s320_s24 = scalar_lea.vmem [#allocation8], %s2867_s9 }
  0x58   : > { %v2489_v2 = vld [vmem:[#allocation6 + $0x38] sm:$0xff]   ;;  %2061 = vmatprep.subr.bf16.mxu0 %v2488_v1  ;;  %2411 = vmatprep.subr.bf16.mxu1 %v2488_v1  ;;  %v2491_v4 = vld [vmem:[#allocation6 + $0x30] sm:$0xff]   ;;  %v2492_v5 = vld [vmem:[#allocation6 + $0x68] sm:$0xff]   ;;  %s1885_s30 = sshll.u32 %s320_s24, 4  ;;  %s1873_s13 = scalar_lea.sflag [#allocation5], %s2867_s9  ;;  %s1886_s30 = int_to_ptr.vmem [resolvable:$true] %s1885_s30 }
  0x59   : > { %2062 = vmatpush3.bf16.msra.mxu0 %v2489_v2  ;;  %2419 = vmatpush3.bf16.msra.mxu1 %v2489_v2  ;;  %v2493_v6 = vld [vmem:[#allocation6 + $0x28] sm:$0xff]   ;;  %v2494_v7 = vld [vmem:[#allocation6 + $0x60] sm:$0xff]   ;;  %v2496_v9 = vld [vmem:[#allocation6 + $0x58] sm:$0xff]   ;;  %s2626_s16 = scalar_lea.vmem %s1886_s30, 16  ;;  %p3257_p13 = scmp.ne.s32.totalorder %s3253_s14, 0 }
  0x5a   : > { %2063 = vmatprep.subr.bf16.mxu0 %v2490_v3  ;;  %2412 = vmatprep.subr.bf16.mxu1 %v2490_v3  ;;  %v2495_v8 = vld [vmem:[#allocation6 + $0x20] sm:$0xff]   ;;  %v2497_v10 = vld [vmem:[#allocation6 + $0x18] sm:$0xff]   ;;  %v2498_v11 = vld [vmem:[#allocation6 + $0x50] sm:$0xff]   ;;  %p2627_p4 = scmp.ne.s32.totalorder %s1886_s30, %s2626_s16  ;;  %s2703_s10 = smov [#allocation8]  }
  0x5b   : > { %v329_v12 = vld [vmem:[%s2871_s12 + $0x8] sm:$0xff]  ;;  %v339_v13 = vld [vmem:[%s2871_s12 + $0x58] sm:$0xff]  ;;  %v2499_v18 = vld [vmem:[#allocation6 + $0x10] sm:$0xff]   ;;  %s2630_s18 = sshll.u32 %s2703_s10, 4  ;;  %s2631_s18 = int_to_ptr.vmem [resolvable:$false] %s2630_s18 }
  0x5c   : > { %v409_v14 = vld [vmem:[%s2871_s12 + $0x288] sm:$0xff]  ;;  %v489_v15 = vpack.c.bf16 %v339_v13, %v329_v12  ;;  %v419_v16 = vld [vmem:[%s2871_s12 + $0x2d8] sm:$0xff]  ;;  %v2502_v21 = vld [vmem:[#allocation6 + $0x40] sm:$0xff]   ;;  %p2628_p5 = pnand %p2627_p4, %p3257_p13  ;;  %s2632_s6 = scalar_lea.vmem %s2631_s18, 32 }
  0x5d   : > { %2064 = vmatpush3.bf16.msra.mxu0 %v2491_v4  ;;  %2420 = vmatpush3.bf16.msra.mxu1 %v2491_v4  ;;  %v529_v17 = vpack.c.bf16 %v419_v16, %v409_v14  ;;  %v2500_v19 = vld [vmem:[#allocation6 + $0x48] sm:$0xff]   ;;  %v2503_v22 = vld [vmem:[#allocation6] sm:$0xff]   ;;  %v338_v24 = vld [vmem:[%s2871_s12 + $0x50] sm:$0xff]  ;;  %p2633_p0 = scmp.lt.s32.totalorder %s1886_s30, %s2631_s18  ;;  %p2634_p7 = scmp.lt.s32.totalorder %s2632_s6, %s2626_s16 }
  0x5e   : > { %2065 = vmatprep.subr.bf16.mxu0 %v2492_v5  ;;  %2413 = vmatprep.subr.bf16.mxu1 %v2492_v5  ;;  %v2501_v20 = vld [vmem:[#allocation6 + $0x8] sm:$0xff]   ;;  %v328_v23 = vld [vmem:[%s2871_s12] sm:$0xff]  ;;  %v418_v26 = vld [vmem:[%s2871_s12 + $0x2d0] sm:$0xff]  ;;  %p2629_p1 = pneg %p2628_p5 }
  0x5f   : > { %1247 = vmatprep.mubr.bf16.mxu0 %v489_v15  ;;  %1279 = vmatprep.mubr.bf16.mxu1 %v529_v17  ;;  %v408_v25 = vld [vmem:[%s2871_s12 + $0x280] sm:$0xff]  ;;  %v2504_v27 = vld [vmem:[#allocation6 + $0xf8] sm:$0xff]   ;;  %v349_v29 = vld [vmem:[%s2871_s12 + $0xa8] sm:$0xff]  ;;  %v488_v34 = vpack.c.bf16 %v338_v24, %v328_v23  ;;  %p2635_p3 = por %p2634_p7, %p2633_p0 }
  0x60   : > { %v2505_v28 = vld [vmem:[#allocation6 + $0x178] sm:$0xff]   ;;  %v429_v33 = vld [vmem:[%s2871_s12 + $0x328] sm:$0xff]  ;;  %v528_v35 = vpack.c.bf16 %v418_v26, %v408_v25  ;;  %v2508_v37 = vld [vmem:[#allocation6 + $0xf0] sm:$0xff]  }
  0x61   : > { %2066 = vmatpush3.bf16.msra.mxu0 %v2493_v6  ;;  %2421 = vmatpush3.bf16.msra.mxu1 %v2493_v6  ;;  %v359_v30 = vld [vmem:[%s2871_s12 + $0xf8] sm:$0xff]  ;;  %v2509_v38 = vld [vmem:[#allocation6 + $0x170] sm:$0xff]   ;;  %v348_v43 = vld [vmem:[%s2871_s12 + $0xa0] sm:$0xff]  ;;  %p2636_p8 = pnand %p2635_p3, %p2629_p1 }
  0x62   : > { %2067 = vmatprep.subr.bf16.mxu0 %v2494_v7  ;;  %2414 = vmatprep.subr.bf16.mxu1 %v2494_v7  ;;  %v2506_v31 = vld [vmem:[#allocation6 + $0xb8] sm:$0xff]   ;;  %v2510_v39 = vld [vmem:[#allocation6 + $0xb0] sm:$0xff]   ;;  %v499_v41 = vpack.c.bf16 %v359_v30, %v349_v29  ;;  %v428_v45 = vld [vmem:[%s2871_s12 + $0x320] sm:$0xff] }
  0x63   : > { %v2507_v32 = vld [vmem:[#allocation6 + $0x138] sm:$0xff]   ;;  %v2511_v40 = vld [vmem:[#allocation6 + $0x130] sm:$0xff]   ;;  %v2512_v47 = vld [vmem:[#allocation6 + $0xe8] sm:$0xff]  }
  0x64   : > { %v439_v36 = vld [vmem:[%s2871_s12 + $0x378] sm:$0xff]  ;;  %v358_v44 = vld [vmem:[%s2871_s12 + $0xf0] sm:$0xff]  ;;  %v2513_v48 = vld [vmem:[#allocation6 + $0x168] sm:$0xff]  }
  0x65   : > { %2068 = vmatpush3.bf16.msra.mxu0 %v2495_v8  ;;  %2422 = vmatpush3.bf16.msra.mxu1 %v2495_v8  ;;  %v539_v42 = vpack.c.bf16 %v439_v36, %v429_v33  ;;  %v438_v46 = vld [vmem:[%s2871_s12 + $0x370] sm:$0xff]  ;;  %v369_v49 = vld [vmem:[%s2871_s12 + $0x148] sm:$0xff]  ;;  %v498_v50 = vpack.c.bf16 %v358_v44, %v348_v43  ;;  %v379_v52 = vld [vmem:[%s2871_s12 + $0x198] sm:$0xff] }
  0x66   : > { %2069 = vmatprep.subr.bf16.mxu0 %v2496_v9  ;;  %2415 = vmatprep.subr.bf16.mxu1 %v2496_v9  ;;  %v538_v51 = vpack.c.bf16 %v438_v46, %v428_v45  ;;  %v449_v53 = vld [vmem:[%s2871_s12 + $0x3c8] sm:$0xff]  ;;  %v459_v54 = vld [vmem:[%s2871_s12 + $0x418] sm:$0xff]  ;;  %v2516_v57 = vld [vmem:[#allocation6 + $0xe0] sm:$0xff]   ;;  %v509_v61 = vpack.c.bf16 %v379_v52, %v369_v49 }
  0x67   : > { %v2514_v55 = vld [vmem:[#allocation6 + $0xa8] sm:$0xff]   ;;  %v2517_v58 = vld [vmem:[#allocation6 + $0x160] sm:$0xff]   ;;  %v549_v62 = vpack.c.bf16 %v459_v54, %v449_v53  ;;  %v378_v0 = vld [vmem:[%s2871_s12 + $0x190] sm:$0xff] }
  0x68   : > { %v2515_v56 = vld [vmem:[#allocation6 + $0x128] sm:$0xff]   ;;  %v2518_v59 = vld [vmem:[#allocation6 + $0xa0] sm:$0xff]   ;;  %v458_v2 = vld [vmem:[%s2871_s12 + $0x410] sm:$0xff] }
  0x69   : > { %2070 = vmatpush3.bf16.msra.mxu0 %v2497_v10  ;;  %2423 = vmatpush3.bf16.msra.mxu1 %v2497_v10  ;;  %v2519_v60 = vld [vmem:[#allocation6 + $0x120] sm:$0xff]   ;;  %v2520_v3 = vld [vmem:[#allocation6 + $0xd8] sm:$0xff]   ;;  %v2524_v9 = vld [vmem:[#allocation6 + $0xd0] sm:$0xff]  }
  0x6a   : > { %2071 = vmatprep.subr.bf16.mxu0 %v2498_v11  ;;  %2416 = vmatprep.subr.bf16.mxu1 %v2498_v11  ;;  %v368_v63 = vld [vmem:[%s2871_s12 + $0x140] sm:$0xff]  ;;  %v2521_v4 = vld [vmem:[#allocation6 + $0x158] sm:$0xff]   ;;  %v2525_v10 = vld [vmem:[#allocation6 + $0x150] sm:$0xff]  }
  0x6b   : > { %v448_v1 = vld [vmem:[%s2871_s12 + $0x3c0] sm:$0xff]  ;;  %v2522_v5 = vld [vmem:[#allocation6 + $0x98] sm:$0xff]   ;;  %v508_v7 = vpack.c.bf16 %v378_v0, %v368_v63  ;;  %v389_v11 = vld [vmem:[%s2871_s12 + $0x1e8] sm:$0xff] }
  0x6c   : > { %v2523_v6 = vld [vmem:[#allocation6 + $0x118] sm:$0xff]   ;;  %v548_v8 = vpack.c.bf16 %v458_v2, %v448_v1  ;;  %v469_v13 = vld [vmem:[%s2871_s12 + $0x468] sm:$0xff]  ;;  %v2526_v14 = vld [vmem:[#allocation6 + $0x90] sm:$0xff]  }
  0x6d   : > { %2072 = vmatpush3.bf16.msra.mxu0 %v2499_v18  ;;  %2424 = vmatpush3.bf16.msra.mxu1 %v2499_v18  ;;  %v399_v12 = vld [vmem:[%s2871_s12 + $0x238] sm:$0xff]  ;;  %v2527_v15 = vld [vmem:[#allocation6 + $0x110] sm:$0xff]   ;;  %v388_v18 = vld [vmem:[%s2871_s12 + $0x1e0] sm:$0xff] }
  0x6e   : > { %2073 = vmatprep.subr.bf16.mxu0 %v2500_v19  ;;  %2417 = vmatprep.subr.bf16.mxu1 %v2500_v19  ;;  %v519_v16 = vpack.c.bf16 %v399_v12, %v389_v11  ;;  %v479_v17 = vld [vmem:[%s2871_s12 + $0x4b8] sm:$0xff]  ;;  %v398_v19 = vld [vmem:[%s2871_s12 + $0x230] sm:$0xff]  ;;  %v2528_v23 = vld [vmem:[#allocation6 + $0xc8] sm:$0xff]  }
  0x6f   : > { %v2529_v24 = vld [vmem:[#allocation6 + $0x148] sm:$0xff]   ;;  %v518_v26 = vpack.c.bf16 %v398_v19, %v388_v18  ;;  %v2532_v29 = vld [vmem:[#allocation6 + $0xc0] sm:$0xff]   ;;  %v331_v33 = vld [vmem:[%s2871_s12 + $0x18] sm:$0xff] }
  0x70   : > { %v2530_v25 = vld [vmem:[#allocation6 + $0x88] sm:$0xff]   ;;  %v2533_v30 = vld [vmem:[#allocation6 + $0x140] sm:$0xff]   ;;  %v343_v36 = vld [vmem:[%s2871_s12 + $0x78] sm:$0xff] }
  0x71   : > { %2074 = vmatpush3.bf16.msra.mxu0 %v2501_v20  ;;  %2425 = vmatpush3.bf16.msra.mxu1 %v2501_v20  ;;  %v559_v20 = vpack.c.bf16 %v479_v17, %v469_v13  ;;  %v2536_v45 = vld [vmem:[#allocation6 + $0x1f8] sm:$0xff]   ;;  %v353_v52 = vld [vmem:[%s2871_s12 + $0xc8] sm:$0xff]  ;;  %v350_v54 = vld [vmem:[%s2871_s12 + $0xb0] sm:$0xff] }
  0x72   : > { %2075 = vmatprep.subr.bf16.mxu0 %v2502_v21  ;;  %2418 = vmatprep.subr.bf16.mxu1 %v2502_v21  ;;  %v468_v21 = vld [vmem:[%s2871_s12 + $0x460] sm:$0xff]  ;;  %v2537_v46 = vld [vmem:[#allocation6 + $0x1b8] sm:$0xff]   ;;  %v2542_v63 = vld [vmem:[#allocation6 + $0x270] sm:$0xff]  }
  0x73   : > { %v351_v49 = vld [vmem:[%s2871_s12 + $0xb8] sm:$0xff]  ;;  %v2543_v0 = vld [vmem:[#allocation6 + $0x230] sm:$0xff]   ;;  %v381_v2 = vld [vmem:[%s2871_s12 + $0x1a8] sm:$0xff] }
  0x74   : > { %v363_v53 = vld [vmem:[%s2871_s12 + $0x118] sm:$0xff]  ;;  %v2544_v11 = vld [vmem:[#allocation6 + $0x1e8] sm:$0xff]  }
  0x75   : > { %2076 = vmatpush3.bf16.msra.mxu0 %v2503_v22  ;;  %2426 = vmatpush3.bf16.msra.mxu1 %v2503_v22  ;;  %v478_v22 = vld [vmem:[%s2871_s12 + $0x4b0] sm:$0xff]  ;;  %v371_v1 = vld [vmem:[%s2871_s12 + $0x158] sm:$0xff]  ;;  %v2545_v12 = vld [vmem:[#allocation6 + $0x1a8] sm:$0xff]  }
  0x76   : > { %2125 = vmatprep.subr.bf16.mxu1 %v2504_v27  ;;  %2189 = vmatprep.subr.bf16.mxu0 %v2505_v28  ;;  %v558_v27 = vpack.c.bf16 %v478_v22, %v468_v21  ;;  %v2531_v28 = vld [vmem:[#allocation6 + $0x108] sm:$0xff]   ;;  %v391_v17 = vld [vmem:[%s2871_s12 + $0x1f8] sm:$0xff] }
  0x77   : > { %v2546_v13 = vld [vmem:[#allocation6 + $0x268] sm:$0xff]  }
  0x78   : > { %1248 = vmatmul.mubr.bf16.vlgmr.msra.gmra.mxu0 %v488_v34  ;;  %1280 = vmatmul.mubr.bf16.vlgmr.msra.gmra.mxu1 %v528_v35  ;;  %v341_v34 = vld [vmem:[%s2871_s12 + $0x68] sm:$0xff] }
  0x79   : > { %2126 = vmatpush3.bf16.msra.mxu1 %v2506_v31  ;;  %2190 = vmatpush3.bf16.msra.mxu0 %v2507_v32  ;;  %v2534_v31 = vld [vmem:[#allocation6 + $0x80] sm:$0xff]   ;;  %v333_v35 = vld [vmem:[%s2871_s12 + $0x28] sm:$0xff] }
  0x7a   : > { %2127 = vmatprep.subr.bf16.mxu1 %v2508_v37  ;;  %2191 = vmatprep.subr.bf16.mxu0 %v2509_v38  ;;  %v2535_v32 = vld [vmem:[#allocation6 + $0x100] sm:$0xff]   ;;  %v491_v37 = vpack.c.bf16 %v341_v34, %v331_v33  ;;  %v493_v38 = vpack.c.bf16 %v343_v36, %v333_v35  ;;  %v401_v18 = vld [vmem:[%s2871_s12 + $0x248] sm:$0xff]  ;;  %v423_v36 = vld [vmem:[%s2871_s12 + $0x2f8] sm:$0xff] }
  0x7b   : > { %1255 = vmatprep.mubr.bf16.mxu0 %v499_v41  ;;  %1287 = vmatprep.mubr.bf16.mxu1 %v539_v42  ;;  %v332_v41 = vld [vmem:[%s2871_s12 + $0x20] sm:$0xff]  ;;  %v342_v42 = vld [vmem:[%s2871_s12 + $0x70] sm:$0xff]  ;;  %v393_v19 = vld [vmem:[%s2871_s12 + $0x208] sm:$0xff]  ;;  %v521_v21 = vpack.c.bf16 %v401_v18, %v391_v17 }
  0x7c   : > { %v492_v44 = vpack.c.bf16 %v342_v42, %v332_v41  ;;  %v413_v35 = vld [vmem:[%s2871_s12 + $0x2a8] sm:$0xff]  ;;  %v420_v41 = vld [vmem:[%s2871_s12 + $0x2e0] sm:$0xff]  ;;  %v483_v18 = vld [vmem:[%s2871_s12 + $0x4d8] sm:$0xff] }
  0x7d   : > { %2128 = vmatpush3.bf16.msra.mxu1 %v2510_v39  ;;  %2192 = vmatpush3.bf16.msra.mxu0 %v2511_v40  ;;  %v330_v39 = vld [vmem:[%s2871_s12 + $0x10] sm:$0xff]  ;;  %v340_v40 = vld [vmem:[%s2871_s12 + $0x60] sm:$0xff]  ;;  %v473_v17 = vld [vmem:[%s2871_s12 + $0x488] sm:$0xff] }
  0x7e   : > { %2129 = vmatprep.subr.bf16.mxu1 %v2512_v47  ;;  %2193 = vmatprep.subr.bf16.mxu0 %v2513_v48  ;;  %v490_v43 = vpack.c.bf16 %v340_v40, %v330_v39  ;;  %v2538_v47 = vld [vmem:[#allocation6 + $0x278] sm:$0xff]   ;;  %v410_v40 = vld [vmem:[%s2871_s12 + $0x290] sm:$0xff]  ;;  %v412_v42 = vld [vmem:[%s2871_s12 + $0x2a0] sm:$0xff] }
  0x7f   : > { %v2539_v48 = vld [vmem:[#allocation6 + $0x238] sm:$0xff]  }
  0x80   : > { %1256 = vmatmul.mubr.bf16.gmra.mxu0 %v498_v50  ;;  %1288 = vmatmul.mubr.bf16.gmra.mxu1 %v538_v51  ;;  %v361_v50 = vld [vmem:[%s2871_s12 + $0x108] sm:$0xff]  ;;  %v2552_v39 = vld [vmem:[#allocation6 + $0x1d8] sm:$0xff]  }
  0x81   : > { %2130 = vmatpush3.bf16.msra.mxu1 %v2514_v55  ;;  %2194 = vmatpush3.bf16.msra.mxu0 %v2515_v56  ;;  %v501_v51 = vpack.c.bf16 %v361_v50, %v351_v49  ;;  %v503_v55 = vpack.c.bf16 %v363_v53, %v353_v52  ;;  %v360_v56 = vld [vmem:[%s2871_s12 + $0x100] sm:$0xff]  ;;  %v433_v49 = vld [vmem:[%s2871_s12 + $0x348] sm:$0xff]  ;;  %v443_v50 = vld [vmem:[%s2871_s12 + $0x398] sm:$0xff] }
  0x82   : > { %2131 = vmatprep.subr.bf16.mxu1 %v2516_v57  ;;  %2195 = vmatprep.subr.bf16.mxu0 %v2517_v58  ;;  %v352_v57 = vld [vmem:[%s2871_s12 + $0xc0] sm:$0xff]  ;;  %v362_v58 = vld [vmem:[%s2871_s12 + $0x110] sm:$0xff] }
  0x83   : > { %1263 = vmatprep.mubr.bf16.mxu0 %v509_v61  ;;  %1295 = vmatprep.mubr.bf16.mxu1 %v549_v62  ;;  %v500_v61 = vpack.c.bf16 %v360_v56, %v350_v54  ;;  %v502_v62 = vpack.c.bf16 %v362_v58, %v352_v57  ;;  %v543_v54 = vpack.c.bf16 %v443_v50, %v433_v49  ;;  %v2557_v56 = vld [vmem:[#allocation6 + $0x190] sm:$0xff]  }
  0x84   : > { %v430_v57 = vld [vmem:[%s2871_s12 + $0x330] sm:$0xff] }
  0x85   : > { %2132 = vmatpush3.bf16.msra.mxu1 %v2518_v59  ;;  %2196 = vmatpush3.bf16.msra.mxu0 %v2519_v60  ;;  %v2540_v59 = vld [vmem:[#allocation6 + $0x1f0] sm:$0xff]  }
  0x86   : > { %2133 = vmatprep.subr.bf16.mxu1 %v2520_v3  ;;  %2197 = vmatprep.subr.bf16.mxu0 %v2521_v4  ;;  %v2541_v60 = vld [vmem:[#allocation6 + $0x1b0] sm:$0xff]   ;;  %v373_v3 = vld [vmem:[%s2871_s12 + $0x168] sm:$0xff]  ;;  %v511_v4 = vpack.c.bf16 %v381_v2, %v371_v1  ;;  %v463_v2 = vld [vmem:[%s2871_s12 + $0x438] sm:$0xff] }
  0x87   : > { %v2558_v58 = vld [vmem:[#allocation6 + $0x250] sm:$0xff]   ;;  %v453_v1 = vld [vmem:[%s2871_s12 + $0x3e8] sm:$0xff] }
  0x88   : > { %1264 = vmatmul.mubr.bf16.gmra.mxu0 %v508_v7  ;;  %1296 = vmatmul.mubr.bf16.gmra.mxu1 %v548_v8  ;;  %v380_v7 = vld [vmem:[%s2871_s12 + $0x1a0] sm:$0xff] }
  0x89   : > { %2134 = vmatpush3.bf16.msra.mxu1 %v2522_v5  ;;  %2198 = vmatpush3.bf16.msra.mxu0 %v2523_v6  ;;  %v383_v5 = vld [vmem:[%s2871_s12 + $0x1b8] sm:$0xff]  ;;  %v370_v6 = vld [vmem:[%s2871_s12 + $0x150] sm:$0xff] }
  0x8a   : > { %2135 = vmatprep.subr.bf16.mxu1 %v2524_v9  ;;  %2199 = vmatprep.subr.bf16.mxu0 %v2525_v10  ;;  %v513_v8 = vpack.c.bf16 %v383_v5, %v373_v3  ;;  %v372_v9 = vld [vmem:[%s2871_s12 + $0x160] sm:$0xff]  ;;  %v382_v10 = vld [vmem:[%s2871_s12 + $0x1b0] sm:$0xff]  ;;  %v2560_v5 = vld [vmem:[#allocation6 + $0x1c8] sm:$0xff]  }
  0x8b   : > { %1271 = vmatprep.mubr.bf16.mxu0 %v519_v16  ;;  %1303 = vmatprep.mubr.bf16.mxu1 %v559_v20  ;;  %v2547_v16 = vld [vmem:[#allocation6 + $0x228] sm:$0xff]   ;;  %v403_v20 = vld [vmem:[%s2871_s12 + $0x258] sm:$0xff] }
  0x8c   : > { %v523_v22 = vpack.c.bf16 %v403_v20, %v393_v19  ;;  %v2564_v19 = vld [vmem:[#allocation6 + $0x1c0] sm:$0xff]  }
  0x8d   : > { %2136 = vmatpush3.bf16.msra.mxu1 %v2526_v14  ;;  %2200 = vmatpush3.bf16.msra.mxu0 %v2527_v15  ;;  %v510_v14 = vpack.c.bf16 %v380_v7, %v370_v6  ;;  %v512_v15 = vpack.c.bf16 %v382_v10, %v372_v9  ;;  %v553_v7 = vpack.c.bf16 %v463_v2, %v453_v1  ;;  %v2562_v9 = vld [vmem:[#allocation6 + $0x248] sm:$0xff]   ;;  %v450_v10 = vld [vmem:[%s2871_s12 + $0x3d0] sm:$0xff]  ;;  %v2565_v20 = vld [vmem:[#allocation6 + $0x180] sm:$0xff]  }
  0x8e   : > { %2137 = vmatprep.subr.bf16.mxu1 %v2528_v23  ;;  %2201 = vmatprep.subr.bf16.mxu0 %v2529_v24  ;;  %v390_v23 = vld [vmem:[%s2871_s12 + $0x1f0] sm:$0xff]  ;;  %v400_v24 = vld [vmem:[%s2871_s12 + $0x240] sm:$0xff] }
  0x8f   : > { %v520_v33 = vpack.c.bf16 %v400_v24, %v390_v23  ;;  %v2566_v23 = vld [vmem:[#allocation6 + $0x240] sm:$0xff]   ;;  %v386_v2 = vld [vmem:[%s2871_s12 + $0x1d0] sm:$0xff] }
  0x90   : > { %1272 = vmatmul.mubr.bf16.gmra.mxu0 %v518_v26  ;;  %1304 = vmatmul.mubr.bf16.gmra.mxu1 %v558_v27  ;;  %v402_v26 = vld [vmem:[%s2871_s12 + $0x250] sm:$0xff]  ;;  %v2548_v27 = vld [vmem:[#allocation6 + $0x1e0] sm:$0xff]  }
  0x91   : > { %2138 = vmatpush3.bf16.msra.mxu1 %v2530_v25  ;;  %2202 = vmatpush3.bf16.msra.mxu0 %v2531_v28  ;;  %v392_v25 = vld [vmem:[%s2871_s12 + $0x200] sm:$0xff] }
  0x92   : > { %2139 = vmatprep.subr.bf16.mxu1 %v2532_v29  ;;  %2203 = vmatprep.subr.bf16.mxu0 %v2533_v30  ;;  %v2549_v28 = vld [vmem:[#allocation6 + $0x1a0] sm:$0xff]   ;;  %v522_v34 = vpack.c.bf16 %v402_v26, %v392_v25  ;;  %v563_v25 = vpack.c.bf16 %v483_v18, %v473_v17  ;;  %v417_v17 = vld [vmem:[%s2871_s12 + $0x2c8] sm:$0xff]  ;;  %v427_v18 = vld [vmem:[%s2871_s12 + $0x318] sm:$0xff] }
  0x93   : > { %1344 = vmatprep.mubr.bf16.mxu1 %v491_v37  ;;  %1441 = vmatprep.mubr.bf16.mxu0 %v493_v38  ;;  %v2550_v29 = vld [vmem:[#allocation6 + $0x260] sm:$0xff]   ;;  %v533_v38 = vpack.c.bf16 %v423_v36, %v413_v35 }
  0x94   : > { %v2551_v30 = vld [vmem:[#allocation6 + $0x220] sm:$0xff]  }
  0x95   : > { %2140 = vmatpush3.bf16.msra.mxu1 %v2534_v31  ;;  %2204 = vmatpush3.bf16.msra.mxu0 %v2535_v32  ;;  %v411_v31 = vld [vmem:[%s2871_s12 + $0x298] sm:$0xff]  ;;  %v421_v32 = vld [vmem:[%s2871_s12 + $0x2e8] sm:$0xff]  ;;  %v2567_v26 = vld [vmem:[#allocation6 + $0x200] sm:$0xff]  }
  0x96   : > { %2253 = vmatprep.subr.bf16.mxu1 %v2536_v45  ;;  %2317 = vmatprep.subr.bf16.mxu0 %v2538_v47  ;;  %v531_v37 = vpack.c.bf16 %v421_v32, %v411_v31  ;;  %v2554_v45 = vld [vmem:[#allocation6 + $0x258] sm:$0xff]   ;;  %v345_v32 = vld [vmem:[%s2871_s12 + $0x88] sm:$0xff]  ;;  %v376_v1 = vld [vmem:[%s2871_s12 + $0x180] sm:$0xff] }
  0x97   : > { %v431_v47 = vld [vmem:[%s2871_s12 + $0x338] sm:$0xff] }
  0x98   : > { %1345 = vmatmul.mubr.bf16.vlgmr.msra.gmra.mxu1 %v490_v43  ;;  %1442 = vmatmul.mubr.bf16.vlgmr.msra.gmra.mxu0 %v492_v44  ;;  %v422_v43 = vld [vmem:[%s2871_s12 + $0x2f0] sm:$0xff]  ;;  %v2553_v44 = vld [vmem:[#allocation6 + $0x198] sm:$0xff]  }
  0x99   : > { %2254 = vmatpush3.bf16.msra.mxu1 %v2537_v46  ;;  %2318 = vmatpush3.bf16.msra.mxu0 %v2539_v48  ;;  %v2555_v46 = vld [vmem:[#allocation6 + $0x218] sm:$0xff]   ;;  %v441_v48 = vld [vmem:[%s2871_s12 + $0x388] sm:$0xff]  ;;  %v532_v52 = vpack.c.bf16 %v422_v43, %v412_v42  ;;  %v346_v42 = vld [vmem:[%s2871_s12 + $0x90] sm:$0xff] }
  0x9a   : > { %1352 = vmatprep.mubr.bf16.mxu1 %v501_v51  ;;  %1449 = vmatprep.mubr.bf16.mxu0 %v503_v55  ;;  %v530_v51 = vpack.c.bf16 %v420_v41, %v410_v40  ;;  %v541_v53 = vpack.c.bf16 %v441_v48, %v431_v47  ;;  %v2556_v55 = vld [vmem:[#allocation6 + $0x1d0] sm:$0xff]   ;;  %v335_v31 = vld [vmem:[%s2871_s12 + $0x38] sm:$0xff]  ;;  %v344_v40 = vld [vmem:[%s2871_s12 + $0x80] sm:$0xff] }
  0x9b   : > { %2255 = vmatprep.subr.bf16.mxu1 %v2540_v59  ;;  %2319 = vmatprep.subr.bf16.mxu0 %v2542_v63  ;;  %v440_v59 = vld [vmem:[%s2871_s12 + $0x380] sm:$0xff]  ;;  %v451_v63 = vld [vmem:[%s2871_s12 + $0x3d8] sm:$0xff] }
  0x9c   : > { %v540_v3 = vpack.c.bf16 %v440_v59, %v430_v57  ;;  %v336_v41 = vld [vmem:[%s2871_s12 + $0x40] sm:$0xff]  ;;  %v355_v43 = vld [vmem:[%s2871_s12 + $0xd8] sm:$0xff]  ;;  %v377_v57 = vld [vmem:[%s2871_s12 + $0x188] sm:$0xff] }
  0x9d   : > { %2256 = vmatpush3.bf16.msra.mxu1 %v2541_v60  ;;  %2320 = vmatpush3.bf16.msra.mxu0 %v2543_v0  ;;  %v2559_v60 = vld [vmem:[#allocation6 + $0x210] sm:$0xff]   ;;  %v461_v0 = vld [vmem:[%s2871_s12 + $0x428] sm:$0xff]  ;;  %v496_v48 = vpack.c.bf16 %v346_v42, %v336_v41  ;;  %v467_v42 = vld [vmem:[%s2871_s12 + $0x458] sm:$0xff] }
  0x9e   : > { %2257 = vmatprep.subr.bf16.mxu1 %v2544_v11  ;;  %2321 = vmatprep.subr.bf16.mxu0 %v2546_v13  ;;  %v551_v6 = vpack.c.bf16 %v461_v0, %v451_v63  ;;  %v460_v11 = vld [vmem:[%s2871_s12 + $0x420] sm:$0xff]  ;;  %v374_v63 = vld [vmem:[%s2871_s12 + $0x170] sm:$0xff]  ;;  %v457_v41 = vld [vmem:[%s2871_s12 + $0x408] sm:$0xff] }
  0x9f   : > { %v452_v13 = vld [vmem:[%s2871_s12 + $0x3e0] sm:$0xff] }
  0xa0   : > { %1353 = vmatmul.mubr.bf16.gmra.mxu1 %v500_v61  ;;  %1450 = vmatmul.mubr.bf16.gmra.mxu0 %v502_v62  ;;  %v432_v61 = vld [vmem:[%s2871_s12 + $0x340] sm:$0xff]  ;;  %v442_v62 = vld [vmem:[%s2871_s12 + $0x390] sm:$0xff] }
  0xa1   : > { %1360 = vmatprep.mubr.bf16.mxu1 %v511_v4  ;;  %1457 = vmatprep.mubr.bf16.mxu0 %v513_v8  ;;  %v542_v4 = vpack.c.bf16 %v442_v62, %v432_v61  ;;  %v2561_v8 = vld [vmem:[#allocation6 + $0x188] sm:$0xff]   ;;  %v384_v0 = vld [vmem:[%s2871_s12 + $0x1c0] sm:$0xff] }
  0xa2   : > { %2258 = vmatpush3.bf16.msra.mxu1 %v2545_v12  ;;  %2322 = vmatpush3.bf16.msra.mxu0 %v2547_v16  ;;  %v2563_v12 = vld [vmem:[#allocation6 + $0x208] sm:$0xff]  }
  0xa3   : > { %2259 = vmatprep.subr.bf16.mxu1 %v2548_v27  ;;  %2323 = vmatprep.subr.bf16.mxu0 %v2550_v29  ;;  %v481_v16 = vld [vmem:[%s2871_s12 + $0x4c8] sm:$0xff]  ;;  %v470_v27 = vld [vmem:[%s2871_s12 + $0x470] sm:$0xff]  ;;  %v472_v29 = vld [vmem:[%s2871_s12 + $0x480] sm:$0xff] }
  0xa6   : > { %2260 = vmatpush3.bf16.msra.mxu1 %v2549_v28  ;;  %2324 = vmatpush3.bf16.msra.mxu0 %v2551_v30  ;;  %v480_v28 = vld [vmem:[%s2871_s12 + $0x4c0] sm:$0xff]  ;;  %v482_v30 = vld [vmem:[%s2871_s12 + $0x4d0] sm:$0xff] }
  0xa7   : > { %2261 = vmatprep.subr.bf16.mxu1 %v2552_v39  ;;  %2325 = vmatprep.subr.bf16.mxu0 %v2554_v45  ;;  %v560_v35 = vpack.c.bf16 %v480_v28, %v470_v27  ;;  %v562_v36 = vpack.c.bf16 %v482_v30, %v472_v29  ;;  %v334_v39 = vld [vmem:[%s2871_s12 + $0x30] sm:$0xff]  ;;  %v357_v45 = vld [vmem:[%s2871_s12 + $0xe8] sm:$0xff]  ;;  %v435_v27 = vld [vmem:[%s2871_s12 + $0x358] sm:$0xff] }
  0xa8   : > { %1361 = vmatmul.mubr.bf16.gmra.mxu1 %v510_v14  ;;  %1458 = vmatmul.mubr.bf16.gmra.mxu0 %v512_v15  ;;  %v462_v14 = vld [vmem:[%s2871_s12 + $0x430] sm:$0xff]  ;;  %v471_v15 = vld [vmem:[%s2871_s12 + $0x478] sm:$0xff]  ;;  %v494_v47 = vpack.c.bf16 %v344_v40, %v334_v39  ;;  %v445_v28 = vld [vmem:[%s2871_s12 + $0x3a8] sm:$0xff] }
  0xa9   : > { %1368 = vmatprep.mubr.bf16.mxu1 %v521_v21  ;;  %1465 = vmatprep.mubr.bf16.mxu0 %v523_v22  ;;  %v550_v21 = vpack.c.bf16 %v460_v11, %v450_v10  ;;  %v552_v22 = vpack.c.bf16 %v462_v14, %v452_v13  ;;  %v561_v24 = vpack.c.bf16 %v481_v16, %v471_v15  ;;  %v394_v11 = vld [vmem:[%s2871_s12 + $0x210] sm:$0xff]  ;;  %v396_v13 = vld [vmem:[%s2871_s12 + $0x220] sm:$0xff]  ;;  %v415_v15 = vld [vmem:[%s2871_s12 + $0x2b8] sm:$0xff] }
  0xaa   : > { %2262 = vmatpush3.bf16.msra.mxu1 %v2553_v44  ;;  %2326 = vmatpush3.bf16.msra.mxu0 %v2555_v46  ;;  %v365_v44 = vld [vmem:[%s2871_s12 + $0x128] sm:$0xff]  ;;  %v367_v46 = vld [vmem:[%s2871_s12 + $0x138] sm:$0xff]  ;;  %v406_v14 = vld [vmem:[%s2871_s12 + $0x270] sm:$0xff] }
  0xab   : > { %2263 = vmatprep.subr.bf16.mxu1 %v2556_v55  ;;  %2327 = vmatprep.subr.bf16.mxu0 %v2558_v58  ;;  %v505_v49 = vpack.c.bf16 %v365_v44, %v355_v43  ;;  %v507_v50 = vpack.c.bf16 %v367_v46, %v357_v45  ;;  %v375_v55 = vld [vmem:[%s2871_s12 + $0x178] sm:$0xff]  ;;  %v425_v16 = vld [vmem:[%s2871_s12 + $0x308] sm:$0xff]  ;;  %v557_v46 = vpack.c.bf16 %v467_v42, %v457_v41 }
  0xac   : > { %v387_v58 = vld [vmem:[%s2871_s12 + $0x1d8] sm:$0xff]  ;;  %v437_v29 = vld [vmem:[%s2871_s12 + $0x368] sm:$0xff] }
  0xad   : > { %v517_v62 = vpack.c.bf16 %v387_v58, %v377_v57  ;;  %v447_v30 = vld [vmem:[%s2871_s12 + $0x3b8] sm:$0xff]  ;;  %v465_v40 = vld [vmem:[%s2871_s12 + $0x448] sm:$0xff] }
  0xae   : > { %2264 = vmatpush3.bf16.msra.mxu1 %v2557_v56  ;;  %2328 = vmatpush3.bf16.msra.mxu0 %v2559_v60  ;;  %v385_v56 = vld [vmem:[%s2871_s12 + $0x1c8] sm:$0xff]  ;;  %v455_v39 = vld [vmem:[%s2871_s12 + $0x3f8] sm:$0xff] }
  0xaf   : > { %2265 = vmatprep.subr.bf16.mxu1 %v2560_v5  ;;  %2329 = vmatprep.subr.bf16.mxu0 %v2562_v9  ;;  %v515_v61 = vpack.c.bf16 %v385_v56, %v375_v55  ;;  %v397_v5 = vld [vmem:[%s2871_s12 + $0x228] sm:$0xff]  ;;  %v555_v45 = vpack.c.bf16 %v465_v40, %v455_v39 }
  0xb0   : > { %1369 = vmatmul.mubr.bf16.gmra.mxu1 %v520_v33  ;;  %1466 = vmatmul.mubr.bf16.gmra.mxu0 %v522_v34  ;;  %v337_v33 = vld [vmem:[%s2871_s12 + $0x48] sm:$0xff]  ;;  %v347_v34 = vld [vmem:[%s2871_s12 + $0x98] sm:$0xff] }
  0xb1   : > { %1376 = vmatprep.mubr.bf16.mxu1 %v531_v37  ;;  %1473 = vmatprep.mubr.bf16.mxu0 %v533_v38  ;;  %v495_v37 = vpack.c.bf16 %v345_v32, %v335_v31  ;;  %v497_v38 = vpack.c.bf16 %v347_v34, %v337_v33  ;;  %v545_v33 = vpack.c.bf16 %v445_v28, %v435_v27 }
  0xb2   : > { %2266 = vmatpush3.bf16.msra.mxu1 %v2561_v8  ;;  %2330 = vmatpush3.bf16.msra.mxu0 %v2563_v12  ;;  %v516_v8 = vpack.c.bf16 %v386_v2, %v376_v1  ;;  %v404_v12 = vld [vmem:[%s2871_s12 + $0x260] sm:$0xff]  ;;  %v547_v34 = vpack.c.bf16 %v447_v30, %v437_v29 }
  0xb3   : > { %2267 = vmatprep.subr.bf16.mxu1 %v2564_v19  ;;  %2331 = vmatprep.subr.bf16.mxu0 %v2566_v23  ;;  %v524_v19 = vpack.c.bf16 %v404_v12, %v394_v11  ;;  %v414_v23 = vld [vmem:[%s2871_s12 + $0x2b0] sm:$0xff] }
  0xb6   : > { %2268 = vmatpush3.bf16.msra.mxu1 %v2565_v20  ;;  %2332 = vmatpush3.bf16.msra.mxu0 %v2567_v26  ;;  %v526_v20 = vpack.c.bf16 %v406_v14, %v396_v13  ;;  %v426_v26 = vld [vmem:[%s2871_s12 + $0x310] sm:$0xff] }
  0xb8   : > { %1377 = vmatmul.mubr.bf16.gmra.mxu1 %v530_v51  ;;  %1474 = vmatmul.mubr.bf16.gmra.mxu0 %v532_v52  ;;  %v354_v51 = vld [vmem:[%s2871_s12 + $0xd0] sm:$0xff]  ;;  %v364_v52 = vld [vmem:[%s2871_s12 + $0x120] sm:$0xff] }
  0xb9   : > { %1384 = vmatprep.mubr.bf16.mxu1 %v541_v53  ;;  %1481 = vmatprep.mubr.bf16.mxu0 %v543_v54  ;;  %v356_v53 = vld [vmem:[%s2871_s12 + $0xe0] sm:$0xff]  ;;  %v366_v54 = vld [vmem:[%s2871_s12 + $0x130] sm:$0xff]  ;;  %v504_v59 = vpack.c.bf16 %v364_v52, %v354_v51  ;;  %v475_v51 = vld [vmem:[%s2871_s12 + $0x498] sm:$0xff] }
  0xba   : > { %v506_v60 = vpack.c.bf16 %v366_v54, %v356_v53  ;;  %v485_v52 = vld [vmem:[%s2871_s12 + $0x4e8] sm:$0xff]  ;;  %v487_v54 = vld [vmem:[%s2871_s12 + $0x4f8] sm:$0xff] }
  0xbb   : > { %v477_v53 = vld [vmem:[%s2871_s12 + $0x4a8] sm:$0xff]  ;;  %v565_v57 = vpack.c.bf16 %v485_v52, %v475_v51 }
  0xbc   : > { %v567_v58 = vpack.c.bf16 %v487_v54, %v477_v53 }
  0xc0   : > { %1385 = vmatmul.mubr.bf16.gmra.mxu1 %v540_v3  ;;  %1482 = vmatmul.mubr.bf16.gmra.mxu0 %v542_v4  ;;  %v395_v3 = vld [vmem:[%s2871_s12 + $0x218] sm:$0xff]  ;;  %v405_v4 = vld [vmem:[%s2871_s12 + $0x268] sm:$0xff] }
  0xc1   : > { %1392 = vmatprep.mubr.bf16.mxu1 %v551_v6  ;;  %1489 = vmatprep.mubr.bf16.mxu0 %v553_v7  ;;  %v407_v6 = vld [vmem:[%s2871_s12 + $0x278] sm:$0xff]  ;;  %v514_v7 = vpack.c.bf16 %v384_v0, %v374_v63  ;;  %v525_v9 = vpack.c.bf16 %v405_v4, %v395_v3 }
  0xc2   : > { %v527_v10 = vpack.c.bf16 %v407_v6, %v397_v5 }
  0xc8   : > { %1393 = vmatmul.mubr.bf16.gmra.mxu1 %v550_v21  ;;  %1490 = vmatmul.mubr.bf16.gmra.mxu0 %v552_v22  ;;  %v535_v21 = vpack.c.bf16 %v425_v16, %v415_v15  ;;  %v537_v22 = vpack.c.bf16 %v427_v18, %v417_v17 }
  0xc9   : > { %1400 = vmatprep.mubr.bf16.mxu1 %v561_v24  ;;  %1497 = vmatprep.mubr.bf16.mxu0 %v563_v25  ;;  %v424_v24 = vld [vmem:[%s2871_s12 + $0x300] sm:$0xff] }
  0xca   : > { %v416_v25 = vld [vmem:[%s2871_s12 + $0x2c0] sm:$0xff]  ;;  %v534_v31 = vpack.c.bf16 %v424_v24, %v414_v23 }
  0xcb   : > { %v536_v32 = vpack.c.bf16 %v426_v26, %v416_v25 }
  0xd0   : > { %1401 = vmatmul.mubr.bf16.gmra.mxu1 %v560_v35  ;;  %1498 = vmatmul.mubr.bf16.gmra.mxu0 %v562_v36  ;;  %v434_v35 = vld [vmem:[%s2871_s12 + $0x350] sm:$0xff]  ;;  %v444_v36 = vld [vmem:[%s2871_s12 + $0x3a0] sm:$0xff] }
  0xd1   : > { %1538 = vmatprep.mubr.bf16.mxu1 %v495_v37  ;;  %1635 = vmatprep.mubr.bf16.mxu0 %v497_v38  ;;  %v436_v37 = vld [vmem:[%s2871_s12 + $0x360] sm:$0xff]  ;;  %v446_v38 = vld [vmem:[%s2871_s12 + $0x3b0] sm:$0xff]  ;;  %v544_v43 = vpack.c.bf16 %v444_v36, %v434_v35 }
  0xd2   : > { %v546_v44 = vpack.c.bf16 %v446_v38, %v436_v37 }
  0xd8   : > { %1539 = vmatmul.mubr.bf16.vlgmr.msra.gmra.mxu1 %v494_v47  ;;  %1636 = vmatmul.mubr.bf16.vlgmr.msra.gmra.mxu0 %v496_v48  ;;  %v454_v47 = vld [vmem:[%s2871_s12 + $0x3f0] sm:$0xff]  ;;  %v464_v48 = vld [vmem:[%s2871_s12 + $0x440] sm:$0xff] }
  0xd9   : > { %1546 = vmatprep.mubr.bf16.mxu1 %v505_v49  ;;  %1643 = vmatprep.mubr.bf16.mxu0 %v507_v50  ;;  %v456_v49 = vld [vmem:[%s2871_s12 + $0x400] sm:$0xff]  ;;  %v466_v50 = vld [vmem:[%s2871_s12 + $0x450] sm:$0xff]  ;;  %v554_v55 = vpack.c.bf16 %v464_v48, %v454_v47 }
  0xda   : > { %v556_v56 = vpack.c.bf16 %v466_v50, %v456_v49  ;;  %v3066_v49 = vld [vmem:[%s3242_s2] ss:$0 sm:$0xff] }
  0xe0   : > { %1547 = vmatmul.mubr.bf16.gmra.mxu1 %v504_v59  ;;  %1644 = vmatmul.mubr.bf16.gmra.mxu0 %v506_v60  ;;  %v474_v59 = vld [vmem:[%s2871_s12 + $0x490] sm:$0xff]  ;;  %v484_v60 = vld [vmem:[%s2871_s12 + $0x4e0] sm:$0xff] }
  0xe1   : > { %1554 = vmatprep.mubr.bf16.mxu1 %v515_v61  ;;  %1651 = vmatprep.mubr.bf16.mxu0 %v517_v62  ;;  %v476_v61 = vld [vmem:[%s2871_s12 + $0x4a0] sm:$0xff]  ;;  %v486_v62 = vld [vmem:[%s2871_s12 + $0x4f0] sm:$0xff]  ;;  %v564_v63 = vpack.c.bf16 %v484_v60, %v474_v59  ;;  %s3203_s12 = scalar_lea.hbm %s3247_s7, %s2058_s25 }
  0xe2   : > { %v566_v0 = vpack.c.bf16 %v486_v62, %v476_v61 }
  0xe8   : > { %1555 = vmatmul.mubr.bf16.gmra.mxu1 %v514_v7  ;;  %1652 = vmatmul.mubr.bf16.gmra.mxu0 %v516_v8 }
  0xe9   : > { %1562 = vmatprep.mubr.bf16.mxu1 %v525_v9  ;;  %1659 = vmatprep.mubr.bf16.mxu0 %v527_v10 }
  0xf0   : > { %1563 = vmatmul.mubr.bf16.gmra.mxu1 %v524_v19  ;;  %1660 = vmatmul.mubr.bf16.gmra.mxu0 %v526_v20 }
  0xf1   : > { %1570 = vmatprep.mubr.bf16.mxu1 %v535_v21  ;;  %1667 = vmatprep.mubr.bf16.mxu0 %v537_v22 }
  0xf8   : > { %1571 = vmatmul.mubr.bf16.gmra.mxu1 %v534_v31  ;;  %1668 = vmatmul.mubr.bf16.gmra.mxu0 %v536_v32 }
  0xf9   : > { %1578 = vmatprep.mubr.bf16.mxu1 %v545_v33  ;;  %1675 = vmatprep.mubr.bf16.mxu0 %v547_v34 }
 0x100   : > { %1579 = vmatmul.mubr.bf16.gmra.mxu1 %v544_v43  ;;  %1676 = vmatmul.mubr.bf16.gmra.mxu0 %v546_v44 }
 0x101   : > { %1586 = vmatprep.mubr.bf16.mxu1 %v555_v45  ;;  %1683 = vmatprep.mubr.bf16.mxu0 %v557_v46 }
 0x108   : > { %1587 = vmatmul.mubr.bf16.gmra.mxu1 %v554_v55  ;;  %1684 = vmatmul.mubr.bf16.gmra.mxu0 %v556_v56 }
 0x109   : > { %1594 = vmatprep.mubr.bf16.mxu1 %v565_v57  ;;  %1691 = vmatprep.mubr.bf16.mxu0 %v567_v58 }
 0x110   : > { %1595 = vmatmul.mubr.bf16.gmra.mxu1 %v564_v63  ;;  %1692 = vmatmul.mubr.bf16.gmra.mxu0 %v566_v0 }
 0x138   : > { %v2077_v1 = vpop.f32.mrf.mxu0  ;;  %v2101_v2 = vpop.f32.mrf.mxu1 }
 0x13a   : > { %v2078_v3 = vpop.f32.mrf.mxu0  ;;  %v2102_v4 = vpop.f32.mrf.mxu1 }
 0x13b   : > { %v2079_v5 = vadd.f32 %v2078_v3, %v2077_v1  ;;  %v3041_v6 = vadd.f32 %v2102_v4, %v2101_v2 }
 0x13c   : > { %v2080_v7 = vpop.f32.mrf.mxu0  ;;  %v2104_v8 = vpop.f32.mrf.mxu1 }
 0x13d   : > { %v1250_v54 = vadd.f32 %v2079_v5, %v3066_v49 }
 0x13e   : > { %v2081_v9 = vpop.f32.mrf.mxu0  ;;  %v2105_v10 = vpop.f32.mrf.mxu1 }
 0x13f   : > { %v2082_v11 = vadd.f32 %v2081_v9, %v2080_v7  ;;  %v3043_v12 = vadd.f32 %v2105_v10, %v2104_v8 }
 0x140   : > { %v2083_v13 = vpop.f32.mrf.mxu0  ;;  %v2107_v14 = vpop.f32.mrf.mxu1 }
 0x141   : > { %v1253_v62 = vadd.f32 %v2082_v11, %v3066_v49 }
 0x142   : > { %v2084_v15 = vpop.f32.mrf.mxu0  ;;  %v2108_v16 = vpop.f32.mrf.mxu1 }
 0x143   : > { %v2085_v17 = vadd.f32 %v2084_v15, %v2083_v13  ;;  %v3045_v18 = vadd.f32 %v2108_v16, %v2107_v14 }
 0x144   : > { %v2086_v19 = vpop.f32.mrf.mxu0  ;;  %v2110_v20 = vpop.f32.mrf.mxu1 }
 0x145   : > { %v1258_v5 = vadd.f32 %v2085_v17, %v3066_v49 }
 0x146   : > { %v2087_v21 = vpop.f32.mrf.mxu0  ;;  %v2111_v22 = vpop.f32.mrf.mxu1 }
 0x147   : > { %v2088_v23 = vadd.f32 %v2087_v21, %v2086_v19  ;;  %v3047_v24 = vadd.f32 %v2111_v22, %v2110_v20 }
 0x148   : > { %v2089_v25 = vpop.f32.mrf.mxu0  ;;  %v2113_v26 = vpop.f32.mrf.mxu1 }
 0x149   : > { %v1261_v20 = vadd.f32 %v2088_v23, %v3066_v49 }
 0x14a   : > { %v2090_v27 = vpop.f32.mrf.mxu0  ;;  %v2114_v28 = vpop.f32.mrf.mxu1 }
 0x14b   : > { %v2091_v29 = vadd.f32 %v2090_v27, %v2089_v25  ;;  %v3049_v30 = vadd.f32 %v2114_v28, %v2113_v26 }
 0x14c   : > { %v2092_v31 = vpop.f32.mrf.mxu0  ;;  %v2116_v32 = vpop.f32.mrf.mxu1 }
 0x14e   : > { %v2093_v33 = vpop.f32.mrf.mxu0  ;;  %v2117_v34 = vpop.f32.mrf.mxu1 }
 0x14f   : > { %v3051_v35 = vadd.f32 %v2093_v33, %v2092_v31  ;;  %v3053_v36 = vadd.f32 %v2117_v34, %v2116_v32  ;;  %v1266_v32 = vadd.f32 %v2091_v29, %v3066_v49 }
 0x150   : > { %v2095_v37 = vpop.f32.mrf.mxu0  ;;  %v2119_v38 = vpop.f32.mrf.mxu1 }
 0x152   : > { %v2096_v39 = vpop.f32.mrf.mxu0  ;;  %v2120_v40 = vpop.f32.mrf.mxu1 }
 0x153   : > { %v3055_v41 = vadd.f32 %v2096_v39, %v2095_v37  ;;  %v3057_v42 = vadd.f32 %v2120_v40, %v2119_v38 }
 0x154   : > { %v2098_v43 = vpop.f32.mrf.mxu0  ;;  %v2122_v44 = vpop.f32.mrf.mxu1 }
 0x156   : > { %v2099_v45 = vpop.f32.mrf.mxu0  ;;  %v2123_v46 = vpop.f32.mrf.mxu1 }
 0x157   : > { %v3059_v47 = vadd.f32 %v2099_v45, %v2098_v43  ;;  %v3061_v48 = vadd.f32 %v2123_v46, %v2122_v44  ;;  %v1269_v44 = vadd.f32 %v3051_v35, %v3066_v49 }
 0x158   : > { %v2141_v50 = vpop.f32.mrf.mxu1  ;;  %v2205_v51 = vpop.f32.mrf.mxu0 }
 0x15a   : > { %v2142_v52 = vpop.f32.mrf.mxu1  ;;  %v2206_v53 = vpop.f32.mrf.mxu0 }
 0x15b   : > { %v2143_v55 = vadd.f32 %v2142_v52, %v2141_v50  ;;  %v2207_v56 = vadd.f32 %v2206_v53, %v2205_v51 }
 0x15c   : > { %v2144_v57 = vpop.f32.mrf.mxu1  ;;  %v2208_v58 = vpop.f32.mrf.mxu0 }
 0x15d   : > { %v1347_v59 = vadd.f32 %v2143_v55, %v1250_v54  ;;  %v1274_v55 = vadd.f32 %v3055_v41, %v3066_v49 }
 0x15e   : > { %v2145_v60 = vpop.f32.mrf.mxu1  ;;  %v2209_v61 = vpop.f32.mrf.mxu0 }
 0x15f   : > { %v3070_v63 = vadd.f32 %v2207_v56, %v1347_v59  ;;  %v2146_v0 = vadd.f32 %v2145_v60, %v2144_v57  ;;  %v2210_v1 = vadd.f32 %v2209_v61, %v2208_v58 }
 0x160   : > { %v2147_v2 = vpop.f32.mrf.mxu1  ;;  %v2211_v3 = vpop.f32.mrf.mxu0 }
 0x161   : > { %v1350_v4 = vadd.f32 %v2146_v0, %v1253_v62  ;;  %v1277_v0 = vadd.f32 %v3059_v47, %v3066_v49 }
 0x162   : > { %v2148_v7 = vpop.f32.mrf.mxu1  ;;  %v2212_v8 = vpop.f32.mrf.mxu0 }
 0x163   : > { %v3073_v9 = vadd.f32 %v2210_v1, %v1350_v4  ;;  %v2149_v10 = vadd.f32 %v2148_v7, %v2147_v2  ;;  %v2213_v13 = vadd.f32 %v2212_v8, %v2211_v3 }
 0x164   : > { %v2150_v14 = vpop.f32.mrf.mxu1  ;;  %v2214_v15 = vpop.f32.mrf.mxu0 }
 0x165   : > { %v1355_v16 = vadd.f32 %v2149_v10, %v1258_v5  ;;  %v1282_v10 = vadd.f32 %v3041_v6, %v3066_v49 }
 0x166   : > { %v2151_v19 = vpop.f32.mrf.mxu1  ;;  %v2215_v11 = vpop.f32.mrf.mxu0 }
 0x167   : > { %v3076_v21 = vadd.f32 %v2213_v13, %v1355_v16  ;;  %v2152_v22 = vadd.f32 %v2151_v19, %v2150_v14  ;;  %v2216_v25 = vadd.f32 %v2215_v11, %v2214_v15 }
 0x168   : > { %v2153_v26 = vpop.f32.mrf.mxu1  ;;  %v2217_v27 = vpop.f32.mrf.mxu0 }
 0x169   : > { %v1358_v28 = vadd.f32 %v2152_v22, %v1261_v20  ;;  %v1285_v22 = vadd.f32 %v3043_v12, %v3066_v49 }
 0x16a   : > { %v2154_v31 = vpop.f32.mrf.mxu1  ;;  %v2218_v17 = vpop.f32.mrf.mxu0 }
 0x16b   : > { %v3079_v33 = vadd.f32 %v2216_v25, %v1358_v28  ;;  %v2155_v34 = vadd.f32 %v2154_v31, %v2153_v26  ;;  %v2219_v37 = vadd.f32 %v2218_v17, %v2217_v27 }
 0x16c   : > { %v2156_v38 = vpop.f32.mrf.mxu1  ;;  %v2220_v39 = vpop.f32.mrf.mxu0 }
 0x16d   : > { %v1363_v40 = vadd.f32 %v2155_v34, %v1266_v32  ;;  %v1290_v34 = vadd.f32 %v3045_v18, %v3066_v49 }
 0x16e   : > { %v2157_v43 = vpop.f32.mrf.mxu1  ;;  %v2221_v23 = vpop.f32.mrf.mxu0 }
 0x16f   : > { %v3083_v45 = vadd.f32 %v2219_v37, %v1363_v40  ;;  %v2158_v46 = vadd.f32 %v2157_v43, %v2156_v38  ;;  %v2222_v50 = vadd.f32 %v2221_v23, %v2220_v39 }
 0x170   : > { %v2159_v51 = vpop.f32.mrf.mxu1  ;;  %v2223_v52 = vpop.f32.mrf.mxu0 }
 0x171   : > { %v1366_v53 = vadd.f32 %v2158_v46, %v1269_v44  ;;  %v1293_v46 = vadd.f32 %v3047_v24, %v3066_v49 }
 0x172   : > { %v2160_v29 = vpop.f32.mrf.mxu1  ;;  %v2224_v54 = vpop.f32.mrf.mxu0 }
 0x173   : > { %v3087_v56 = vadd.f32 %v2222_v50, %v1366_v53  ;;  %v2161_v57 = vadd.f32 %v2160_v29, %v2159_v51  ;;  %v2225_v58 = vadd.f32 %v2224_v54, %v2223_v52 }
 0x174   : > { %v2162_v59 = vpop.f32.mrf.mxu1  ;;  %v2226_v60 = vpop.f32.mrf.mxu0 }
 0x175   : > { %v1371_v61 = vadd.f32 %v2161_v57, %v1274_v55  ;;  %v1298_v57 = vadd.f32 %v3049_v30, %v3066_v49 }
 0x176   : > { %v2163_v35 = vpop.f32.mrf.mxu1  ;;  %v2227_v62 = vpop.f32.mrf.mxu0 }
 0x177   : > { %v3091_v1 = vadd.f32 %v2225_v58, %v1371_v61  ;;  %v2164_v2 = vadd.f32 %v2163_v35, %v2162_v59  ;;  %v2228_v3 = vadd.f32 %v2227_v62, %v2226_v60 }
 0x178   : > { %v2165_v4 = vpop.f32.mrf.mxu1  ;;  %v2229_v7 = vpop.f32.mrf.mxu0 }
 0x179   : > { %v1374_v8 = vadd.f32 %v2164_v2, %v1277_v0  ;;  %v1301_v2 = vadd.f32 %v3053_v36, %v3066_v49 }
 0x17a   : > { %v2166_v41 = vpop.f32.mrf.mxu1  ;;  %v2230_v5 = vpop.f32.mrf.mxu0 }
 0x17b   : > { %v3095_v13 = vadd.f32 %v2228_v3, %v1374_v8  ;;  %v2167_v14 = vadd.f32 %v2166_v41, %v2165_v4  ;;  %v2231_v15 = vadd.f32 %v2230_v5, %v2229_v7 }
 0x17c   : > { %v2168_v16 = vpop.f32.mrf.mxu1  ;;  %v2232_v19 = vpop.f32.mrf.mxu0 }
 0x17d   : > { %v1379_v11 = vadd.f32 %v2167_v14, %v1282_v10  ;;  %v1306_v14 = vadd.f32 %v3057_v42, %v3066_v49  ;;  %v2568_v42 = vld [vmem:[%s3243_s3] sm:$0xff]  }
 0x17e   : > { %v2169_v47 = vpop.f32.mrf.mxu1  ;;  %v2233_v20 = vpop.f32.mrf.mxu0  ;;  %2407 = vmatprep.mubr.bf16.mxu1 %v2568_v42 }
 0x17f   : > { %v3099_v25 = vadd.f32 %v2231_v15, %v1379_v11  ;;  %v2170_v26 = vadd.f32 %v2169_v47, %v2168_v16  ;;  %v2234_v27 = vadd.f32 %v2233_v20, %v2232_v19 }
 0x180   : > { %v2171_v28 = vpop.f32.mrf.mxu1  ;;  %v2235_v31 = vpop.f32.mrf.mxu0 }
 0x181   : > { %v1382_v17 = vadd.f32 %v2170_v26, %v1285_v22 }
 0x182   : > { %v2172_v6 = vpop.f32.mrf.mxu1  ;;  %v2236_v32 = vpop.f32.mrf.mxu0 }
 0x183   : > { %v3103_v37 = vadd.f32 %v2234_v27, %v1382_v17  ;;  %v2173_v38 = vadd.f32 %v2172_v6, %v2171_v28  ;;  %v2237_v39 = vadd.f32 %v2236_v32, %v2235_v31 }
 0x184   : > { %v2174_v40 = vpop.f32.mrf.mxu1  ;;  %v2238_v43 = vpop.f32.mrf.mxu0 }
 0x185   : > { %v1387_v23 = vadd.f32 %v2173_v38, %v1290_v34 }
 0x186   : > { %v2175_v12 = vpop.f32.mrf.mxu1  ;;  %v2239_v44 = vpop.f32.mrf.mxu0 }
 0x187   : > { %v3107_v50 = vadd.f32 %v2237_v39, %v1387_v23  ;;  %v2176_v51 = vadd.f32 %v2175_v12, %v2174_v40  ;;  %v2240_v52 = vadd.f32 %v2239_v44, %v2238_v43 }
 0x188   : > { %v2177_v53 = vpop.f32.mrf.mxu1  ;;  %v2241_v29 = vpop.f32.mrf.mxu0 }
 0x189   : > { %v1390_v54 = vadd.f32 %v2176_v51, %v1293_v46 }
 0x18a   : > { %v2178_v18 = vpop.f32.mrf.mxu1  ;;  %v2242_v55 = vpop.f32.mrf.mxu0 }
 0x18b   : > { %v3111_v58 = vadd.f32 %v2240_v52, %v1390_v54  ;;  %v2179_v59 = vadd.f32 %v2178_v18, %v2177_v53  ;;  %v2243_v60 = vadd.f32 %v2242_v55, %v2241_v29  ;;  %v1728_v53 = vld [vmem:[%s3244_s4] sm:$0xff]  ;;  %v1730_v29 = vld [vmem:[%s3244_s4 + $0x10] sm:$0xff] }
 0x18c   : > { %v2180_v61 = vpop.f32.mrf.mxu1  ;;  %v2244_v35 = vpop.f32.mrf.mxu0 }
 0x18d   : > { %v1395_v62 = vadd.f32 %v2179_v59, %v1298_v57 }
 0x18e   : > { %v2181_v24 = vpop.f32.mrf.mxu1  ;;  %v2245_v0 = vpop.f32.mrf.mxu0 }
 0x18f   : > { %v3115_v3 = vadd.f32 %v2243_v60, %v1395_v62  ;;  %v2182_v4 = vadd.f32 %v2181_v24, %v2180_v61  ;;  %v2246_v7 = vadd.f32 %v2245_v0, %v2244_v35  ;;  %v1729_v61 = vld [vmem:[%s3244_s4 + $0x8] sm:$0xff]  ;;  %v1731_v0 = vld [vmem:[%s3244_s4 + $0x18] sm:$0xff] }
 0x190   : > { %v2183_v8 = vpop.f32.mrf.mxu1  ;;  %v2247_v41 = vpop.f32.mrf.mxu0 }
 0x191   : > { %v1398_v5 = vadd.f32 %v2182_v4, %v1301_v2 }
 0x192   : > { %v2184_v30 = vpop.f32.mrf.mxu1  ;;  %v2248_v10 = vpop.f32.mrf.mxu0 }
 0x193   : > { %v3119_v15 = vadd.f32 %v2246_v7, %v1398_v5  ;;  %v2185_v16 = vadd.f32 %v2184_v30, %v2183_v8  ;;  %v2249_v19 = vadd.f32 %v2248_v10, %v2247_v41 }
 0x194   : > { %v3121_v11 = vpop.f32.mrf.mxu1  ;;  %v3123_v47 = vpop.f32.mrf.mxu0 }
 0x195   : > { %v1403_v36 = vadd.f32 %v2185_v16, %v1306_v14  ;;  %v1817_v14 = vld [vmem:[%s3245_s5] sm:$0xff]  ;;  %v1818_v16 = vld [vmem:[%s3245_s5 + $0x8] sm:$0xff] }
 0x196   : > { %v3125_v20 = vpop.f32.mrf.mxu1  ;;  %v3127_v22 = vpop.f32.mrf.mxu0 }
 0x197   : > { %v3129_v26 = vadd.f32 %v2249_v19, %v1403_v36 }
 0x198   : > { %v2269_v27 = vpop.f32.mrf.mxu1  ;;  %v2333_v28 = vpop.f32.mrf.mxu0 }
 0x19a   : > { %v2270_v31 = vpop.f32.mrf.mxu1  ;;  %v2334_v17 = vpop.f32.mrf.mxu0 }
 0x19b   : > { %v2271_v6 = vadd.f32 %v2270_v31, %v2269_v27  ;;  %v2335_v32 = vadd.f32 %v2334_v17, %v2333_v28 }
 0x19c   : > { %v2272_v34 = vpop.f32.mrf.mxu1  ;;  %v2336_v38 = vpop.f32.mrf.mxu0 }
 0x19d   : > { %v1541_v39 = vadd.f32 %v2271_v6, %v3070_v63  ;;  %v2702_v63 = vmov 0   ;;  %v1819_v6 = vld [vmem:[%s3245_s5 + $0x10] sm:$0xff] }
 0x19e   : > { %v2273_v40 = vpop.f32.mrf.mxu1  ;;  %v2337_v43 = vpop.f32.mrf.mxu0  ;;  %2486 = vset.pattern.permute.xlu0 %v2702_v63  ;;  %2487 = vset.pattern.permute.xlu1 %v2702_v63 }
 0x19f   : > { %v1638_v23 = vadd.f32 %v2335_v32, %v1541_v39  ;;  %v2274_v12 = vadd.f32 %v2273_v40, %v2272_v34  ;;  %v2338_v44 = vadd.f32 %v2337_v43, %v2336_v38  ;;  %1734 = vperm.xlu0 %2486, %v1728_v53   ;;  %1744 = vperm.xlu1 %2487, %v1730_v29   ;;  %v1820_v38 = vld [vmem:[%s3245_s5 + $0x18] sm:$0xff] }
 0x1a0   : > { %v2275_v46 = vpop.f32.mrf.mxu1  ;;  %v2339_v51 = vpop.f32.mrf.mxu0 }
 0x1a1   : > { %v1544_v52 = vadd.f32 %v2274_v12, %v3073_v9  ;;  %v1700_v35 = vmax.f32 %v1638_v23, 0.0 }
 0x1a2   : > { %v2276_v54 = vpop.f32.mrf.mxu1  ;;  %v2340_v18 = vpop.f32.mrf.mxu0 }
 0x1a3   : > { %v1641_v55 = vadd.f32 %v2338_v44, %v1544_v52  ;;  %v2277_v57 = vadd.f32 %v2276_v54, %v2275_v46  ;;  %v2341_v59 = vadd.f32 %v2340_v18, %v2339_v51  ;;  %1739 = vperm.xlu0 %2486, %v1729_v61   ;;  %1749 = vperm.xlu1 %2487, %v1731_v0   ;;  %v1854_v52 = vld [vmem:[#allocation2] sm:$0x1] }
 0x1a4   : > { %v2278_v60 = vpop.f32.mrf.mxu1  ;;  %v2342_v9 = vpop.f32.mrf.mxu0 }
 0x1a5   : > { %v1701_v62 = vmax.f32 %v1641_v55, 0.0  ;;  %v1549_v24 = vadd.f32 %v2277_v57, %v3076_v21 }
 0x1a6   : > { %v2279_v2 = vpop.f32.mrf.mxu1  ;;  %v2343_v4 = vpop.f32.mrf.mxu0 }
 0x1a7   : > { %v1646_v7 = vadd.f32 %v2341_v59, %v1549_v24  ;;  %v2280_v8 = vadd.f32 %v2279_v2, %v2278_v60  ;;  %v2344_v41 = vadd.f32 %v2343_v4, %v2342_v9  ;;  %v3149_v5 = vpack.c.bf16 %v1701_v62, %v1700_v35  ;;  %1823 = vperm.xlu0 %2486, %v1817_v14  }
 0x1a8   : > { %v2281_v30 = vpop.f32.mrf.mxu1  ;;  %v2345_v10 = vpop.f32.mrf.mxu0  ;;  %1828 = vperm.xlu1 %2487, %v1818_v16  }
 0x1a9   : > { %v1552_v21 = vadd.f32 %v2280_v8, %v3079_v33  ;;  %v1702_v32 = vmax.f32 %v1646_v7, 0.0 }
 0x1aa   : > { %v2282_v19 = vpop.f32.mrf.mxu1  ;;  %v2346_v36 = vpop.f32.mrf.mxu0 }
 0x1ab   : > { %v1649_v27 = vadd.f32 %v2344_v41, %v1552_v21  ;;  %v2283_v28 = vadd.f32 %v2282_v19, %v2281_v30  ;;  %v2347_v31 = vadd.f32 %v2346_v36, %v2345_v10  ;;  %1833 = vperm.xlu0 %2486, %v1819_v6  }
 0x1ac   : > { %v2284_v17 = vpop.f32.mrf.mxu1  ;;  %v2348_v42 = vpop.f32.mrf.mxu0  ;;  %1838 = vperm.xlu1 %2487, %v1820_v38  }
 0x1ad   : > { %v1703_v34 = vmax.f32 %v1649_v27, 0.0  ;;  %v1557_v33 = vadd.f32 %v2283_v28, %v3083_v45 }
 0x1ae   : > { %v2285_v39 = vpop.f32.mrf.mxu1  ;;  %v2349_v40 = vpop.f32.mrf.mxu0 }
 0x1af   : > { %v1654_v43 = vadd.f32 %v2347_v31, %v1557_v33  ;;  %v2286_v23 = vadd.f32 %v2285_v39, %v2284_v17  ;;  %v2350_v12 = vadd.f32 %v2349_v40, %v2348_v42  ;;  %v3165_v44 = vpack.c.bf16 %v1703_v34, %v1702_v32  ;;  %1857 = vperm.xlu0 %2486, %v1854_v52  }
 0x1b0   : > { %v2287_v46 = vpop.f32.mrf.mxu1  ;;  %v2351_v51 = vpop.f32.mrf.mxu0 }
 0x1b1   : > { %v1560_v53 = vadd.f32 %v2286_v23, %v3087_v56  ;;  %v1704_v57 = vmax.f32 %v1654_v43, 0.0 }
 0x1b2   : > { %v2288_v29 = vpop.f32.mrf.mxu1  ;;  %v2352_v45 = vpop.f32.mrf.mxu0 }
 0x1b3   : > { %v1657_v54 = vadd.f32 %v2350_v12, %v1560_v53  ;;  %v2289_v18 = vadd.f32 %v2288_v29, %v2287_v46  ;;  %v2353_v9 = vadd.f32 %v2352_v45, %v2351_v51 }
 0x1b4   : > { %v2290_v63 = vpop.f32.mrf.mxu1  ;;  %v2354_v55 = vpop.f32.mrf.mxu0 }
 0x1b5   : > { %v1705_v59 = vmax.f32 %v1657_v54, 0.0  ;;  %v1565_v60 = vadd.f32 %v2289_v18, %v3091_v1 }
 0x1b6   : > { %v2291_v61 = vpop.f32.mrf.mxu1  ;;  %v2355_v35 = vpop.f32.mrf.mxu0 }
 0x1b7   : > { %v1662_v62 = vadd.f32 %v2353_v9, %v1565_v60  ;;  %v2292_v24 = vadd.f32 %v2291_v61, %v2290_v63  ;;  %v3169_v0 = vpack.c.bf16 %v1705_v59, %v1704_v57  ;;  %v2356_v7 = vadd.f32 %v2355_v35, %v2354_v55 }
 0x1b8   : > { %v2293_v2 = vpop.f32.mrf.mxu1  ;;  %v2357_v56 = vpop.f32.mrf.mxu0 }
 0x1b9   : > { %v1568_v4 = vadd.f32 %v2292_v24, %v3095_v13  ;;  %v1706_v16 = vmax.f32 %v1662_v62, 0.0 }
 0x1ba   : > { %v2294_v8 = vpop.f32.mrf.mxu1  ;;  %v2358_v41 = vpop.f32.mrf.mxu0 }
 0x1bb   : > { %v1665_v30 = vadd.f32 %v2356_v7, %v1568_v4  ;;  %v2295_v10 = vadd.f32 %v2294_v8, %v2293_v2  ;;  %v2359_v28 = vadd.f32 %v2358_v41, %v2357_v56  ;;  %v2188_v4 = vadd.f32 %v3125_v20, %v3121_v11 }
 0x1bc   : > { %v2296_v14 = vpop.f32.mrf.mxu1  ;;  %v2360_v21 = vpop.f32.mrf.mxu0  ;;  %v2252_v11 = vadd.f32 %v3127_v22, %v3123_v47  ;;  %v2569_v47 = vld [vmem:[%s3243_s3 + $0x8] sm:$0xff]  }
 0x1bd   : > { %v1707_v1 = vmax.f32 %v1665_v30, 0.0  ;;  %v1573_v19 = vadd.f32 %v2295_v10, %v3099_v25  ;;  %v1309_v10 = vadd.f32 %v3061_v48, %v3066_v49 }
 0x1be   : > { %v2297_v36 = vpop.f32.mrf.mxu1  ;;  %v2361_v27 = vpop.f32.mrf.mxu0 }
 0x1bf   : > { %v2298_v31 = vadd.f32 %v2297_v36, %v2296_v14  ;;  %v3173_v17 = vpack.c.bf16 %v1707_v1, %v1706_v16  ;;  %v1670_v13 = vadd.f32 %v2359_v28, %v1573_v19  ;;  %v2362_v34 = vadd.f32 %v2361_v27, %v2360_v21 }
 0x1c0   : > { %v2299_v42 = vpop.f32.mrf.mxu1  ;;  %v2363_v6 = vpop.f32.mrf.mxu0 }
 0x1c1   : > { %v1576_v32 = vadd.f32 %v2298_v31, %v3103_v37  ;;  %v1708_v12 = vmax.f32 %v1670_v13, 0.0 }
 0x1c2   : > { %v2300_v33 = vpop.f32.mrf.mxu1  ;;  %v2364_v38 = vpop.f32.mrf.mxu0 }
 0x1c3   : > { %v1673_v39 = vadd.f32 %v2362_v34, %v1576_v32  ;;  %v2301_v40 = vadd.f32 %v2300_v33, %v2299_v42  ;;  %v2365_v53 = vadd.f32 %v2364_v38, %v2363_v6 }
 0x1c4   : > { %v2302_v43 = vpop.f32.mrf.mxu1  ;;  %v2366_v23 = vpop.f32.mrf.mxu0 }
 0x1c5   : > { %v1709_v25 = vmax.f32 %v1673_v39, 0.0  ;;  %v1581_v46 = vadd.f32 %v2301_v40, %v3107_v50 }
 0x1c6   : > { %v2303_v51 = vpop.f32.mrf.mxu1  ;;  %v2367_v52 = vpop.f32.mrf.mxu0 }
 0x1c7   : > { %v2304_v29 = vadd.f32 %v2303_v51, %v2302_v43  ;;  %v1724_v45 = vpack.c.bf16 %v1709_v25, %v1708_v12  ;;  %v1678_v63 = vadd.f32 %v2365_v53, %v1581_v46  ;;  %v2368_v55 = vadd.f32 %v2367_v52, %v2366_v23 }
 0x1c8   : > { %v2305_v54 = vpop.f32.mrf.mxu1  ;;  %v2369_v18 = vpop.f32.mrf.mxu0 }
 0x1c9   : > { %v1584_v37 = vadd.f32 %v2304_v29, %v3111_v58  ;;  %v1710_v62 = vmax.f32 %v1678_v63, 0.0 }
 0x1ca   : > { %v2306_v57 = vpop.f32.mrf.mxu1  ;;  %v2370_v59 = vpop.f32.mrf.mxu0 }
 0x1cb   : > { %v1681_v60 = vadd.f32 %v2368_v55, %v1584_v37  ;;  %v2307_v9 = vadd.f32 %v2306_v57, %v2305_v54  ;;  %v2371_v7 = vadd.f32 %v2370_v59, %v2369_v18 }
 0x1cc   : > { %v2308_v61 = vpop.f32.mrf.mxu1  ;;  %v2372_v35 = vpop.f32.mrf.mxu0 }
 0x1cd   : > { %v1711_v24 = vmax.f32 %v1681_v60, 0.0  ;;  %v1589_v50 = vadd.f32 %v2307_v9, %v3115_v3  ;;  %v1406_v3 = vadd.f32 %v2188_v4, %v1309_v10 }
 0x1ce   : > { %v2309_v2 = vpop.f32.mrf.mxu1  ;;  %v2373_v56 = vpop.f32.mrf.mxu0 }
 0x1cf   : > { %v2310_v8 = vadd.f32 %v2309_v2, %v2308_v61  ;;  %v1725_v41 = vpack.c.bf16 %v1711_v24, %v1710_v62  ;;  %v1686_v14 = vadd.f32 %v2371_v7, %v1589_v50  ;;  %v2374_v16 = vadd.f32 %v2373_v56, %v2372_v35 }
 0x1d0   : > { %v2311_v58 = vpop.f32.mrf.mxu1  ;;  %v2375_v30 = vpop.f32.mrf.mxu0  ;;  %v1503_v49 = vadd.f32 %v2252_v11, %v1406_v3  ;;  %v1860_v50 = vlaneseq }
 0x1d1   : > { %v1592_v21 = vadd.f32 %v2310_v8, %v3119_v15  ;;  %v1712_v20 = vmax.f32 %v1686_v14, 0.0 }
 0x1d2   : > { %v2312_v1 = vpop.f32.mrf.mxu1  ;;  %v2376_v19 = vpop.f32.mrf.mxu0  ;;  %v1861_v4 = vshrl.u32 %v1860_v50, 7 }
 0x1d3   : > { %v1689_v36 = vadd.f32 %v2374_v16, %v1592_v21  ;;  %v2313_v27 = vadd.f32 %v2312_v1, %v2311_v58  ;;  %v2377_v32 = vadd.f32 %v2376_v19, %v2375_v30 }
 0x1d4   : > { %v2314_v28 = vpop.f32.mrf.mxu1  ;;  %v2378_v31 = vpop.f32.mrf.mxu0 }
 0x1d5   : > { %v1713_v42 = vmax.f32 %v1689_v36, 0.0  ;;  %v1597_v6 = vadd.f32 %v2313_v27, %v3129_v26 }
 0x1d6   : > { %v2315_v13 = vpop.f32.mrf.mxu1  ;;  %v2379_v48 = vpop.f32.mrf.mxu0 }
 0x1d7   : > { %v2316_v15 = vadd.f32 %v2315_v13, %v2314_v28  ;;  %v1726_v34 = vpack.c.bf16 %v1713_v42, %v1712_v20  ;;  %v1694_v33 = vadd.f32 %v2377_v32, %v1597_v6  ;;  %v2380_v39 = vadd.f32 %v2379_v48, %v2378_v31 }
 0x1d9   : > { %v1600_v38 = vadd.f32 %v2316_v15, %v1503_v49  ;;  %v1714_v43 = vmax.f32 %v1694_v33, 0.0 }
 0x1db   : > { %v1697_v40 = vadd.f32 %v2380_v39, %v1600_v38 }
 0x1dd   : > { %v1715_v23 = vmax.f32 %v1697_v40, 0.0 }
 0x1df   : > { %v1727_v12 = vpack.c.bf16 %v1715_v23, %v1714_v43 }
 0x1e1   : > { %2391 = vmatprep.subr.bf16.mxu1 %v1727_v12 }
 0x1e2   : > { %2392 = vmatpush3.bf16.xpose.msra.mxu1 %v1727_v12 }
 0x1e3   : > { %2393 = vmatprep.subr.bf16.mxu1 %v1726_v34 }
 0x1ea   : > { %2394 = vmatpush3.bf16.xpose.msra.mxu1 %v1726_v34 }
 0x1eb   : > { %2395 = vmatprep.subr.bf16.mxu1 %v1725_v41 }
 0x1f2   : > { %2396 = vmatpush3.bf16.xpose.msra.mxu1 %v1725_v41  ;;  %v1862_v41 = vsub.s32 0, %v1861_v4 }
 0x1f3   : > { %2397 = vmatprep.subr.bf16.mxu1 %v1724_v45 }
 0x1fa   : > { %2398 = vmatpush3.bf16.xpose.msra.mxu1 %v1724_v45 }
 0x1fb   : > { %2399 = vmatprep.subr.bf16.mxu1 %v3173_v17 }
 0x202   : > { %2400 = vmatpush3.bf16.xpose.msra.mxu1 %v3173_v17 }
 0x203   : > { %2401 = vmatprep.subr.bf16.mxu1 %v3169_v0 }
 0x20a   : > { %2402 = vmatpush3.bf16.xpose.msra.mxu1 %v3169_v0 }
 0x20b   : > { %2403 = vmatprep.subr.bf16.mxu1 %v3165_v44 }
 0x212   : > { %2404 = vmatpush3.bf16.xpose.msra.mxu1 %v3165_v44 }
 0x213   : > { %2405 = vmatprep.subr.bf16.mxu1 %v3149_v5 }
 0x21a   : > { %2406 = vmatpush3.bf16.xpose.msra.mxu1 %v3149_v5  ;;  %v1735_v22 = vpop.permute.xlu0 %1734  ;;  %v1745_v26 = vpop.permute.xlu1 %1744 }
 0x21e   : > { %v1740_v17 = vpop.permute.xlu0 %1739  ;;  %v1750_v46 = vpop.permute.xlu1 %1749 }
 0x221   : > { %2408 = vmatmul.mubr.bf16.vlgmr.msra.gmra.mxu1 %v2569_v47 }
 0x222   : > { %v1824_v29 = vpop.permute.xlu0 %1823 }
 0x223   : > { %v1829_v5 = vpop.permute.xlu1 %1828 }
 0x226   : > { %v1834_v60 = vpop.permute.xlu0 %1833 }
 0x227   : > { %v1839_v35 = vpop.permute.xlu1 %1838 }
 0x22a   : > { %v1858_v30 = vpop.permute.xlu0 %1857 }
 0x22b   : > { %v1863_v14 = vrot.slane %v1858_v30, %v1862_v41 }
 0x2e1   : > { %v2409_v25 = vpop.f32.mrf.mxu1 }
 0x2e2   : > { %v1807_v53 = vadd.f32 %v2409_v25, %v1745_v26 }
 0x2e3   : > { %v1798_v51 = vpop.f32.mrf.mxu1 }
 0x2e4   : > { %v1799_v0 = vadd.f32 %v1798_v51, %v1735_v22  ;;  %v1815_v63 = vmax.f32 %v1807_v53, 0.0 }
 0x2e5   : > { %v2410_v52 = vpop.f32.mrf.mxu1 }
 0x2e6   : > { %v1813_v45 = vmax.f32 %v1799_v0, 0.0  ;;  %v1810_v54 = vadd.f32 %v2410_v52, %v1750_v46  ;;  %v1843_v9 = vmul.f32 %v1834_v60, %v1815_v63 }
 0x2e7   : > { %v1801_v44 = vpop.f32.mrf.mxu1 }
 0x2e8   : > { %v1802_v18 = vadd.f32 %v1801_v44, %v1740_v17  ;;  %v1841_v55 = vmul.f32 %v1824_v29, %v1813_v45  ;;  %v1816_v57 = vmax.f32 %v1810_v54, 0.0 }
 0x2ea   : > { %v1814_v37 = vmax.f32 %v1802_v18, 0.0  ;;  %v1844_v62 = vmul.f32 %v1839_v35, %v1816_v57 }
 0x2ec   : > { %v1842_v59 = vmul.f32 %v1829_v5, %v1814_v37 }
 0x2ee   : > { %v1845_v61 = vadd.f32 %v1842_v59, %v1841_v55 }
 0x2f0   : > { %v1846_v24 = vadd.f32 %v1845_v61, %v1843_v9 }
 0x2f2   : > { %v1847_v2 = vadd.f32 %v1846_v24, %v1844_v62 }
 0x2f4   : > { %v1848_v56 = vrot.slane %v1847_v2, 4 }
 0x2f6   : > { %v1849_v7 = vadd.f32 %v1848_v56, %v1847_v2 }
 0x2f8   : > { %v1850_v8 = vrot.slane %v1849_v7, 2 }
 0x2fa   : > { %v1851_v58 = vadd.f32 %v1850_v8, %v1849_v7 }
 0x2fc   : > { %v1852_v10 = vrot.slane %v1851_v58, 1 }
 0x2fe   : > { %v1853_v21 = vadd.f32 %v1852_v10, %v1851_v58 }
 0x300   : > { %v1864_v16 = vadd.f32 %v1863_v14, %v1853_v21 }
 0x302   : > { %v2057_v1 = vmul.f32 -1.442695, %v1864_v16 }
 0x304   : > { %2570 = vpow2.f32 %v2057_v1 }
 0x311   : > { %v2571_v19 = vpop.eup %2570 }
 0x312   : > { %v1868_v3 = vadd.f32 1.0, %v2571_v19 }
 0x314   : > { %2572 = vrcp.f32 %v1868_v3 }
 0x321   : > { %v2573_v36 = vpop.eup %2572 }
 0x322   : > { %1871 = vst [vmem:[%s320_s24] sm:$0x1] %v2573_v36 }
 0x323   : > { %2639 = shalt.err (!%p2636_p8)
}
 0x324   : > { %s2640_s20 = scalar_lea.hbm %s3203_s12, 16  ;;  %s2644_s21 = scalar_lea.hbm %s3247_s7, 32 }
 0x325   : > { %p2641_p9 = scmp.ne.s32.totalorder %s3203_s12, %s2640_s20  ;;  %p2645_p12 = scmp.lt.s32.totalorder %s3203_s12, %s3247_s7 }
 0x326   : > { %p2646_p2 = scmp.lt.s32.totalorder %s2644_s21, %s2640_s20 }
 0x327   : > { %p2642_p6 = pnand %p2641_p9, %p3257_p13 }
 0x328   : > { %p2647_p10 = por %p2646_p2, %p2645_p12 }
 0x329   : > { %p2643_p11 = pneg %p2642_p6 }
 0x32b   : > { %p2648_p4 = pnand %p2647_p10, %p2643_p11 }
 0x32d   : > { %2651 = shalt.err (!%p2648_p4)
}
 0x32e   : > { %2435 = dma.vmem_to_hbm [thread:$0]  (%p3257_p13), %s1886_s30, 16, %s3203_s12, %s1873_s13  }
 0x32f PF: > { %s1897_s24 = sand.u32 1, %s2682_s26   ;;  %p3258_p5 = scmp.ne.s32.totalorder %s3254_s15, 0 }
 0x330   : > { %p3259_p1 = scmp.ge.s32.totalorder %s2694_s29, 2  ;;  %s1898_s17 = scalar_lea.sflag [#allocation5], %s1897_s24 }
 0x332   : > { %p2442_p0 = pnand %p3259_p1, %p3258_p5 }
 0x334   : > { %p2443_p7 = pneg %p2442_p0 }
 0x336   : > { %2677 = dma.done.wait (%p2443_p7), %s1898_s17, 16  }
 0x337   : > { %2679 = vsyncadd (%p2443_p7), %s1898_s17, 4294967280  ;;  %p23_p3 = scmp.ge.s32.totalorder %s2772_s8, 4   ;;  %s3260_s26 = smov %s2686_s27 }
 0x338   : > { %s3261_s27 = smov %s2690_s28  ;;  %s3262_s28 = smov %s2784_s11 }
 0x339   : > { %s3263_s29 = smov %s2772_s8  ;;  %25 = sbr.rel (!%p23_p3) target bundleno = 9 (0x9), region = 97 }
 0x33e   :  { %1902 = vsyncpa [#allocation4], 1 }
 0x33f   :  { %1904 = vsyncpa [#allocation4 + $0x1], 1 }
 0x340   :  { %1905 = vsyncpa [#allocation7], 1 }
 0x341   :  { %1906 = vsyncpa [#allocation5], 1 }
 0x342   :  { %1908 = vsyncpa [#allocation5 + $0x1], 1 }

</bundles_post_ra>
